<compile_context>
chip_gen: v5e
topology: v5e:2x2
jax: 0.10.0
libtpu: 0.0.40
codegen_flags: <defaults>
</compile_context>

<pallas_src>
import jax
import jax.numpy as jnp
from jax import lax
from jax.experimental import pallas as pl
from jax.experimental.pallas import tpu as pltpu

HIDDEN = 32
MAX_NODES = 8
NODE_TYPE_NUM = 10
MODEL_ZOO_NUM = 4
BATCH = 8            # number of graphs; must be divisible by MODEL_ZOO_NUM
TEXT_DIM = 768


def gru_forward_kernel(tv_ref, xg_ref, ms_ref, wtv_ref, wbf_ref, misc_ref,
                       out_ref):
    # tv_ref   : (B, 1536)   bf16  cat([v, t], -1)
    # xg_ref   : (N, B, 3H)  f32   precomputed x-side gate acts (non-start nodes)
    # ms_ref   : (N, B, N+1) f32   [:, :, :N] incoming-edge mask, [:, :, N] final-node flag
    # wtv_ref  : (1536, H)   bf16  folded text weights
    # wbf_ref  : (H, 8H)     bf16  [wh_all | wx_scaled | wo1]
    # misc_ref : (8, 128)    f32   bias slab
    # out_ref  : (B, 128)    f32   logit broadcast across lanes (col 0 used)
    N, B, _ = xg_ref.shape
    H = HIDDEN

    # ---- unpack weight slabs (one-time prologue loads) ---------------------
    wbf = wbf_ref[...]
    wh = wbf[:, 0:4 * H]                    # (H, 4H) recurrence weights
    wx = wbf[:, 4 * H:7 * H]                # (H, 3H) start-node x gates (LN folded)
    wo1 = wbf[:, 7 * H:8 * H]               # (H, H)  readout layer 1

    misc = misc_ref[...]                    # (8, 128) f32
    b_start = misc[0:1, 0:H]
    ln_wx_b = misc[0:1, H:4 * H]            # ln_b @ wx_all + x-side gate biases
    bu = misc[1:2, 0:H]
    bo1 = misc[1:2, H:2 * H]
    wo2 = misc[1:2, 2 * H:3 * H]
    bo2 = misc[1:2, 3 * H:3 * H + 1]

    # ---- start node: folded text projection + LayerNorm + x-gate matmul ----
    start = jnp.dot(tv_ref[...], wtv_ref[...],
                    preferred_element_type=jnp.float32) + b_start          # (B, H)
    mu = jnp.mean(start, axis=-1, keepdims=True)
    var = jnp.mean((start - mu) ** 2, axis=-1, keepdims=True)
    xn = (start - mu) * lax.rsqrt(var + 1e-6)
    xg0 = jnp.dot(xn.astype(jnp.bfloat16), wx,
                  preferred_element_type=jnp.float32) + ln_wx_b            # (B, 3H)

    bu_b = jnp.broadcast_to(bu, (B, H))     # hoisted bias broadcast

    # ---- sequential GRU recurrence, states carried in vregs -----------------
    states = []
    final = jnp.zeros((B, H), jnp.float32)
    for i in range(N):
        ms_i = ms_ref[i]                                     # (B, N+1) view
        xg_i = xg0 if i == 0 else xg_ref[i]                  # (B, 3H)
        if i == 0:
            h_i = jnp.zeros((B, H), jnp.float32)
        else:
            # only predecessors s < i can be non-zero (matches reference)
            h_i = ms_i[:, 0:1] * states[0]
            for s in range(1, i):
                h_i = h_i + ms_i[:, s:s + 1] * states[s]
        g = jnp.dot(h_i.astype(jnp.bfloat16), wh,
                    preferred_element_type=jnp.float32)      # (B, 4H)
        r = jax.nn.sigmoid(xg_i[:, 0:H] + g[:, 0:H])
        z = jax.nn.sigmoid(xg_i[:, H:2 * H] + g[:, H:2 * H])
        h_tilde = jnp.tanh(xg_i[:, 2 * H:3 * H] + g[:, 2 * H:3 * H]
                           + r * (g[:, 3 * H:4 * H] + bu_b))
        # reference custom cell: h_new = (1 - z) * h_i + z * h_tilde
        h_new = (1.0 - z) * h_i + z * h_tilde
        states.append(h_new)
        # fused final-state gather via the precomputed selector column
        final = final + ms_i[:, N:N + 1] * h_new

    # ---- readout MLP: W_out_2(leaky_relu(W_out_1(final))) -------------------
    hmid = jnp.dot(final.astype(jnp.bfloat16), wo1,
                   preferred_element_type=jnp.float32) + bo1
    hmid = jnp.where(hmid >= 0, hmid, 0.01 * hmid)           # leaky_relu(0.01)
    logit = jnp.sum(hmid * wo2, axis=-1, keepdims=True) + bo2              # (B, 1)
    out_ref[...] = jnp.broadcast_to(logit, out_ref.shape)    # lane-dense store


def make_params(key):
    keys = iter(jax.random.split(key, 32))
    H = HIDDEN

    def xavier(fan_in, fan_out):
        bound = (6.0 / (fan_in + fan_out)) ** 0.5
        return jax.random.uniform(next(keys), (fan_in, fan_out), jnp.float32,
                                  -bound, bound)

    def zeros(n):
        return jnp.zeros((1, n), jnp.float32)

    return dict(
        emb=jax.random.normal(next(keys), (NODE_TYPE_NUM + 1, H), jnp.float32),
        wt=xavier(TEXT_DIM, H), bt=zeros(H),
        wv=xavier(TEXT_DIM, H), bv=zeros(H),
        wnp=xavier(H, H), bnp=zeros(H),
        wsn=xavier(2 * H, H), bsn=zeros(H),
        ln_g=jnp.ones((1, H), jnp.float32), ln_b=zeros(H),
        wr=xavier(2 * H, H), br=zeros(H),
        ur=xavier(H, H), bur=zeros(H),
        wz=xavier(2 * H, H), bz=zeros(H),
        uz=xavier(H, H), buz=zeros(H),
        ww=xavier(2 * H, H), bw=zeros(H),
        uu=xavier(H, H), bu=zeros(H),
        wo1=xavier(H, H), bo1=zeros(H),
        wo2=xavier(H, 1), bo2=jnp.zeros((1, 1), jnp.float32),
    )


def pack_params(params):
    """Glue: fold text path + LayerNorm affine, precompute the per-node-type
    x-gate table, and pack everything into 4 arrays (3 of which reach the kernel)."""
    H = HIDDEN

    # fold t/v projections through W_start_node (cat order is (v, t))
    wsn_v, wsn_t = params["wsn"][:H], params["wsn"][H:]
    wtv = jnp.concatenate([params["wv"] @ wsn_v, params["wt"] @ wsn_t], axis=0)
    b_start = params["bv"] @ wsn_v + params["bt"] @ wsn_t + params["bsn"]     # (1, H)

    # split gate weights into x-side / h-side; h-side W* and U* sum (both mult h_i)
    wr_x, wr_h = params["wr"][:H], params["wr"][H:]
    wz_x, wz_h = params["wz"][:H], params["wz"][H:]
    ww_x, ww_h = params["ww"][:H], params["ww"][H:]
    wx_all = jnp.concatenate([wr_x, wz_x, ww_x], axis=1)                      # (H, 3H)
    wh_all = jnp.concatenate([wr_h + params["ur"], wz_h + params["uz"],
                              ww_h, params["uu"]], axis=1)                    # (H, 4H)
    # all gate biases except bu (which sits inside r * (U h + bu)) fold into x-side
    xg_bias = jnp.concatenate([params["br"] + params["bur"],
                               params["bz"] + params["buz"],
                               params["bw"]], axis=1)                         # (1, 3H)

    # fold LayerNorm affine into the start node's x-gate weights
    wx_scaled = params["ln_g"].reshape(H, 1) * wx_all                         # (H, 3H)
    ln_wx_b = params["ln_b"] @ wx_all + xg_bias                               # (1, 3H)

    # precompute non-start x-gate table: emb -> node_proj -> LN -> x gates (+bias)
    tbl = params["emb"] @ params["wnp"] + params["bnp"]                       # (11, H)
    mu = tbl.mean(-1, keepdims=True)
    var = ((tbl - mu) ** 2).mean(-1, keepdims=True)
    tbl = (tbl - mu) * lax.rsqrt(var + 1e-6) * params["ln_g"] + params["ln_b"]
    xg_table = tbl @ wx_all + xg_bias                                         # (11, 3H)

    # bf16 MXU weight slab: [wh_all | wx_scaled | wo1]  -> (H, 8H)
    w_bf16 = jnp.concatenate([wh_all, wx_scaled, params["wo1"]],
                             axis=1).astype(jnp.bfloat16)

    # f32 bias slab (8 x 128)
    misc = jnp.zeros((8, 4 * H), jnp.float32)
    misc = misc.at[0, 0:H].set(b_start[0])
    misc = misc.at[0, H:4 * H].set(ln_wx_b[0])
    misc = misc.at[1, 0:H].set(params["bu"][0])
    misc = misc.at[1, H:2 * H].set(params["bo1"][0])
    misc = misc.at[1, 2 * H:3 * H].set(params["wo2"][:, 0])
    misc = misc.at[1, 3 * H].set(params["bo2"][0, 0])

    return dict(xg_table=xg_table,
                wtv=wtv.astype(jnp.bfloat16),     # only big weights go bf16 on HBM
                w_bf16=w_bf16,
                misc=misc)


def gru_forward(packed, m_idx, edge_index, t, v, labels=None, is_train=False):
    B, N, H = t.shape[0], MAX_NODES, HIDDEN

    # glue: node-major, per-node x-side gate activations (gathered from table)
    xg_nodes = jnp.take(packed["xg_table"], m_idx, axis=0).reshape(B, N, 3 * H)
    xg_nodes = jnp.transpose(xg_nodes, (1, 0, 2))                       # (N, B, 3H)

    # glue: node-major dense adjacency + final-node selector column
    src, dst = edge_index[0], edge_index[1]
    b_ids = src // N
    masks = jnp.zeros((B, N, N), jnp.float32).at[b_ids, dst % N, src % N].set(1.0)
    last_idx = jnp.sum((jnp.sum(masks, axis=2) > 0).astype(jnp.int32), axis=1)
    # NOTE: if every node has an incoming edge, last_idx == N and the selector
    # is all-zero (final state 0); the PyTorch reference would index OOB there.
    sel = (last_idx[:, None] == jnp.arange(N)[None, :]).astype(jnp.float32)
    masks_sel = jnp.concatenate(
        [jnp.transpose(masks, (1, 0, 2)), sel.T[:, :, None]], axis=2)   # (N, B, N+1)

    # glue: text inputs concatenated (v first, t second — matches W_start_node)
    tv = jnp.concatenate([v, t], axis=-1).astype(jnp.bfloat16)          # (B, 1536)

    out = pl.pallas_call(
        gru_forward_kernel,
        out_shape=jax.ShapeDtypeStruct((B, 128), jnp.float32),
        in_specs=[pl.BlockSpec(memory_space=pltpu.MemorySpace.VMEM)] * 6,
        out_specs=pl.BlockSpec(memory_space=pltpu.MemorySpace.VMEM),
    )(tv, xg_nodes, masks_sel, packed["wtv"], packed["w_bf16"], packed["misc"])

    logits = out[:, 0:1].reshape(-1, MODEL_ZOO_NUM)
    if is_train:
        labels = labels.reshape(-1, MODEL_ZOO_NUM)
        # BCEWithLogitsLoss (mean reduction), 'bce' branch of the reference module
        loss = jnp.mean(jnp.maximum(logits, 0.0) - logits * labels +
                        jnp.log1p(jnp.exp(-jnp.abs(logits))))
        return loss
    return logits
    # TODO(synk): 'cce' (MultilabelCategoricalCrossEntropyLoss) branch not implemented.


if __name__ == "__main__":
    key = jax.random.PRNGKey(0)
    kp, kt, kv, km, kl = jax.random.split(key, 5)
    params = make_params(kp)
    packed = pack_params(params)

    t = jax.random.normal(kt, (BATCH, TEXT_DIM), jnp.float32)
    v = jax.random.normal(kv, (BATCH, TEXT_DIM), jnp.float32)
    m_idx = jax.random.randint(km, (BATCH * MAX_NODES,), 0, NODE_TYPE_NUM + 1)

    # simple chain DAG per graph: local edges 0->1->2->3->4 (global node ids)
    src, dst = [], []
    for b in range(BATCH):
        for i in range(4):
            src.append(b * MAX_NODES + i)
            dst.append(b * MAX_NODES + i + 1)
    edge_index = jnp.array([src, dst], dtype=jnp.int32)

    labels = (jax.random.uniform(kl, (BATCH // MODEL_ZOO_NUM, MODEL_ZOO_NUM)) > 0.5
              ).astype(jnp.float32)

    logits = gru_forward(packed, m_idx, edge_index, t, v, is_train=False)
    jax.block_until_ready(logits)
    assert logits.shape == (BATCH // MODEL_ZOO_NUM, MODEL_ZOO_NUM)

    loss = gru_forward(packed, m_idx, edge_index, t, v, labels=labels, is_train=True)
    jax.block_until_ready(loss)

    print("KERNEL_OK")
</pallas_src>

<mosaic_0001>
module attributes {stable_mosaic.version = 11 : i64} {
  func.func @gru_forward_kernel(%arg0: memref<8x1536xbf16, #tpu.memory_space<vmem>>, %arg1: memref<8x8x96xf32, #tpu.memory_space<vmem>>, %arg2: memref<8x8x9xf32, #tpu.memory_space<vmem>>, %arg3: memref<1536x32xbf16, #tpu.memory_space<vmem>>, %arg4: memref<32x256xbf16, #tpu.memory_space<vmem>>, %arg5: memref<8x128xf32, #tpu.memory_space<vmem>>, %arg6: memref<8x128xf32, #tpu.memory_space<vmem>>) attributes {dimension_semantics = [], scalar_prefetch = 0 : i64, scratch_operands = 0 : i64, tpu.core_type = #tpu.core_type<tc>} {
    %c0 = arith.constant 0 : index
    %c0_0 = arith.constant 0 : index
    %0 = vector.load %arg4[%c0, %c0_0] : memref<32x256xbf16, #tpu.memory_space<vmem>>, vector<32x256xbf16>
    %1 = vector.extract_strided_slice %0 {offsets = [0, 0], sizes = [32, 128], strides = [1, 1]} : vector<32x256xbf16> to vector<32x128xbf16>
    %2 = vector.extract_strided_slice %0 {offsets = [0, 128], sizes = [32, 96], strides = [1, 1]} : vector<32x256xbf16> to vector<32x96xbf16>
    %3 = vector.extract_strided_slice %0 {offsets = [0, 224], sizes = [32, 32], strides = [1, 1]} : vector<32x256xbf16> to vector<32x32xbf16>
    %c0_1 = arith.constant 0 : index
    %c0_2 = arith.constant 0 : index
    %4 = vector.load %arg5[%c0_1, %c0_2] : memref<8x128xf32, #tpu.memory_space<vmem>>, vector<8x128xf32>
    %5 = vector.extract_strided_slice %4 {offsets = [0, 0], sizes = [1, 32], strides = [1, 1]} : vector<8x128xf32> to vector<1x32xf32>
    %6 = vector.extract_strided_slice %4 {offsets = [0, 32], sizes = [1, 96], strides = [1, 1]} : vector<8x128xf32> to vector<1x96xf32>
    %7 = vector.extract_strided_slice %4 {offsets = [1, 0], sizes = [1, 32], strides = [1, 1]} : vector<8x128xf32> to vector<1x32xf32>
    %8 = vector.extract_strided_slice %4 {offsets = [1, 32], sizes = [1, 32], strides = [1, 1]} : vector<8x128xf32> to vector<1x32xf32>
    %9 = vector.extract_strided_slice %4 {offsets = [1, 64], sizes = [1, 32], strides = [1, 1]} : vector<8x128xf32> to vector<1x32xf32>
    %10 = vector.extract_strided_slice %4 {offsets = [1, 96], sizes = [1, 1], strides = [1, 1]} : vector<8x128xf32> to vector<1x1xf32>
    %c0_3 = arith.constant 0 : index
    %c0_4 = arith.constant 0 : index
    %11 = vector.load %arg0[%c0_3, %c0_4] : memref<8x1536xbf16, #tpu.memory_space<vmem>>, vector<8x1536xbf16>
    %c0_5 = arith.constant 0 : index
    %c0_6 = arith.constant 0 : index
    %12 = vector.load %arg3[%c0_5, %c0_6] : memref<1536x32xbf16, #tpu.memory_space<vmem>>, vector<1536x32xbf16>
    %cst = arith.constant dense<0.000000e+00> : vector<8x32xf32>
    %13 = tpu.matmul %11, %12, %cst {dimension_numbers = #tpu.dot_dimension_numbers<[1], [0], [0], [1], [0, 0, 1, 1], [], []>} : vector<8x1536xbf16>, vector<1536x32xbf16>, vector<8x32xf32> -> vector<8x32xf32>
    %14 = vector.broadcast %5 : vector<1x32xf32> to vector<8x32xf32>
    %15 = arith.addf %13, %14 : vector<8x32xf32>
    %cst_7 = arith.constant dense<0.000000e+00> : vector<8xf32>
    %16 = vector.multi_reduction <add>, %15, %cst_7 [1] : vector<8x32xf32> to vector<8xf32>
    %17 = vector.shape_cast %16 : vector<8xf32> to vector<8x1xf32>
    %cst_8 = arith.constant 3.200000e+01 : f32
    %18 = vector.broadcast %cst_8 : f32 to vector<8x1xf32>
    %19 = arith.divf %17, %18 : vector<8x1xf32>
    %20 = vector.broadcast %19 : vector<8x1xf32> to vector<8x32xf32>
    %21 = arith.subf %15, %20 : vector<8x32xf32>
    %22 = arith.mulf %21, %21 : vector<8x32xf32>
    %cst_9 = arith.constant dense<0.000000e+00> : vector<8xf32>
    %23 = vector.multi_reduction <add>, %22, %cst_9 [1] : vector<8x32xf32> to vector<8xf32>
    %24 = vector.shape_cast %23 : vector<8xf32> to vector<8x1xf32>
    %cst_10 = arith.constant 3.200000e+01 : f32
    %25 = vector.broadcast %cst_10 : f32 to vector<8x1xf32>
    %26 = arith.divf %24, %25 : vector<8x1xf32>
    %27 = vector.broadcast %19 : vector<8x1xf32> to vector<8x32xf32>
    %28 = arith.subf %15, %27 : vector<8x32xf32>
    %cst_11 = arith.constant 9.99999997E-7 : f32
    %29 = vector.broadcast %cst_11 : f32 to vector<8x1xf32>
    %30 = arith.addf %26, %29 : vector<8x1xf32>
    %31 = math.rsqrt %30 : vector<8x1xf32>
    %32 = vector.broadcast %31 : vector<8x1xf32> to vector<8x32xf32>
    %33 = arith.mulf %28, %32 : vector<8x32xf32>
    %34 = arith.truncf %33 : vector<8x32xf32> to vector<8x32xbf16>
    %cst_12 = arith.constant dense<0.000000e+00> : vector<8x96xf32>
    %35 = tpu.matmul %34, %2, %cst_12 {dimension_numbers = #tpu.dot_dimension_numbers<[1], [0], [0], [1], [0, 0, 1, 1], [], []>} : vector<8x32xbf16>, vector<32x96xbf16>, vector<8x96xf32> -> vector<8x96xf32>
    %36 = vector.broadcast %6 : vector<1x96xf32> to vector<8x96xf32>
    %37 = arith.addf %35, %36 : vector<8x96xf32>
    %38 = vector.shape_cast %7 : vector<1x32xf32> to vector<1x32xf32>
    %39 = vector.broadcast %38 : vector<1x32xf32> to vector<8x32xf32>
    %cst_13 = arith.constant 0.000000e+00 : f32
    %40 = vector.broadcast %cst_13 : f32 to vector<8x32xf32>
    %c0_14 = arith.constant 0 : index
    %c0_15 = arith.constant 0 : index
    %c0_16 = arith.constant 0 : index
    %41 = vector.load %arg2[%c0_14, %c0_15, %c0_16] : memref<8x8x9xf32, #tpu.memory_space<vmem>>, vector<1x8x9xf32>
    %42 = vector.shape_cast %41 : vector<1x8x9xf32> to vector<8x9xf32>
    %cst_17 = arith.constant 0.000000e+00 : f32
    %43 = vector.broadcast %cst_17 : f32 to vector<8x32xf32>
    %44 = arith.truncf %43 : vector<8x32xf32> to vector<8x32xbf16>
    %cst_18 = arith.constant dense<0.000000e+00> : vector<8x128xf32>
    %45 = tpu.matmul %44, %1, %cst_18 {dimension_numbers = #tpu.dot_dimension_numbers<[1], [0], [0], [1], [0, 0, 1, 1], [], []>} : vector<8x32xbf16>, vector<32x128xbf16>, vector<8x128xf32> -> vector<8x128xf32>
    %46 = vector.extract_strided_slice %37 {offsets = [0, 0], sizes = [8, 32], strides = [1, 1]} : vector<8x96xf32> to vector<8x32xf32>
    %47 = vector.extract_strided_slice %45 {offsets = [0, 0], sizes = [8, 32], strides = [1, 1]} : vector<8x128xf32> to vector<8x32xf32>
    %48 = arith.addf %46, %47 : vector<8x32xf32>
    %49 = arith.negf %48 : vector<8x32xf32>
    %50 = math.exp %49 : vector<8x32xf32>
    %cst_19 = arith.constant 1.000000e+00 : f32
    %51 = vector.broadcast %cst_19 : f32 to vector<8x32xf32>
    %52 = arith.addf %51, %50 : vector<8x32xf32>
    %53 = arith.divf %51, %52 : vector<8x32xf32>
    %54 = vector.extract_strided_slice %37 {offsets = [0, 32], sizes = [8, 32], strides = [1, 1]} : vector<8x96xf32> to vector<8x32xf32>
    %55 = vector.extract_strided_slice %45 {offsets = [0, 32], sizes = [8, 32], strides = [1, 1]} : vector<8x128xf32> to vector<8x32xf32>
    %56 = arith.addf %54, %55 : vector<8x32xf32>
    %57 = arith.negf %56 : vector<8x32xf32>
    %58 = math.exp %57 : vector<8x32xf32>
    %cst_20 = arith.constant 1.000000e+00 : f32
    %59 = vector.broadcast %cst_20 : f32 to vector<8x32xf32>
    %60 = arith.addf %59, %58 : vector<8x32xf32>
    %61 = arith.divf %59, %60 : vector<8x32xf32>
    %62 = vector.extract_strided_slice %37 {offsets = [0, 64], sizes = [8, 32], strides = [1, 1]} : vector<8x96xf32> to vector<8x32xf32>
    %63 = vector.extract_strided_slice %45 {offsets = [0, 64], sizes = [8, 32], strides = [1, 1]} : vector<8x128xf32> to vector<8x32xf32>
    %64 = arith.addf %62, %63 : vector<8x32xf32>
    %65 = vector.extract_strided_slice %45 {offsets = [0, 96], sizes = [8, 32], strides = [1, 1]} : vector<8x128xf32> to vector<8x32xf32>
    %66 = arith.addf %65, %39 : vector<8x32xf32>
    %67 = arith.mulf %53, %66 : vector<8x32xf32>
    %68 = arith.addf %64, %67 : vector<8x32xf32>
    %69 = math.tanh %68 : vector<8x32xf32>
    %cst_21 = arith.constant 1.000000e+00 : f32
    %70 = vector.broadcast %cst_21 : f32 to vector<8x32xf32>
    %71 = arith.subf %70, %61 : vector<8x32xf32>
    %72 = arith.mulf %71, %43 : vector<8x32xf32>
    %73 = arith.mulf %61, %69 : vector<8x32xf32>
    %74 = arith.addf %72, %73 : vector<8x32xf32>
    %75 = vector.extract_strided_slice %42 {offsets = [0, 8], sizes = [8, 1], strides = [1, 1]} : vector<8x9xf32> to vector<8x1xf32>
    %76 = vector.broadcast %75 : vector<8x1xf32> to vector<8x32xf32>
    %77 = arith.mulf %76, %74 : vector<8x32xf32>
    %78 = arith.addf %40, %77 : vector<8x32xf32>
    %c1 = arith.constant 1 : index
    %c0_22 = arith.constant 0 : index
    %c0_23 = arith.constant 0 : index
    %79 = vector.load %arg2[%c1, %c0_22, %c0_23] : memref<8x8x9xf32, #tpu.memory_space<vmem>>, vector<1x8x9xf32>
    %80 = vector.shape_cast %79 : vector<1x8x9xf32> to vector<8x9xf32>
    %c1_24 = arith.constant 1 : index
    %c0_25 = arith.constant 0 : index
    %c0_26 = arith.constant 0 : index
    %81 = vector.load %arg1[%c1_24, %c0_25, %c0_26] : memref<8x8x96xf32, #tpu.memory_space<vmem>>, vector<1x8x96xf32>
    %82 = vector.shape_cast %81 : vector<1x8x96xf32> to vector<8x96xf32>
    %83 = vector.extract_strided_slice %80 {offsets = [0, 0], sizes = [8, 1], strides = [1, 1]} : vector<8x9xf32> to vector<8x1xf32>
    %84 = vector.broadcast %83 : vector<8x1xf32> to vector<8x32xf32>
    %85 = arith.mulf %84, %74 : vector<8x32xf32>
    %86 = arith.truncf %85 : vector<8x32xf32> to vector<8x32xbf16>
    %cst_27 = arith.constant dense<0.000000e+00> : vector<8x128xf32>
    %87 = tpu.matmul %86, %1, %cst_27 {dimension_numbers = #tpu.dot_dimension_numbers<[1], [0], [0], [1], [0, 0, 1, 1], [], []>} : vector<8x32xbf16>, vector<32x128xbf16>, vector<8x128xf32> -> vector<8x128xf32>
    %88 = vector.extract_strided_slice %82 {offsets = [0, 0], sizes = [8, 32], strides = [1, 1]} : vector<8x96xf32> to vector<8x32xf32>
    %89 = vector.extract_strided_slice %87 {offsets = [0, 0], sizes = [8, 32], strides = [1, 1]} : vector<8x128xf32> to vector<8x32xf32>
    %90 = arith.addf %88, %89 : vector<8x32xf32>
    %91 = arith.negf %90 : vector<8x32xf32>
    %92 = math.exp %91 : vector<8x32xf32>
    %cst_28 = arith.constant 1.000000e+00 : f32
    %93 = vector.broadcast %cst_28 : f32 to vector<8x32xf32>
    %94 = arith.addf %93, %92 : vector<8x32xf32>
    %95 = arith.divf %93, %94 : vector<8x32xf32>
    %96 = vector.extract_strided_slice %82 {offsets = [0, 32], sizes = [8, 32], strides = [1, 1]} : vector<8x96xf32> to vector<8x32xf32>
    %97 = vector.extract_strided_slice %87 {offsets = [0, 32], sizes = [8, 32], strides = [1, 1]} : vector<8x128xf32> to vector<8x32xf32>
    %98 = arith.addf %96, %97 : vector<8x32xf32>
    %99 = arith.negf %98 : vector<8x32xf32>
    %100 = math.exp %99 : vector<8x32xf32>
    %cst_29 = arith.constant 1.000000e+00 : f32
    %101 = vector.broadcast %cst_29 : f32 to vector<8x32xf32>
    %102 = arith.addf %101, %100 : vector<8x32xf32>
    %103 = arith.divf %101, %102 : vector<8x32xf32>
    %104 = vector.extract_strided_slice %82 {offsets = [0, 64], sizes = [8, 32], strides = [1, 1]} : vector<8x96xf32> to vector<8x32xf32>
    %105 = vector.extract_strided_slice %87 {offsets = [0, 64], sizes = [8, 32], strides = [1, 1]} : vector<8x128xf32> to vector<8x32xf32>
    %106 = arith.addf %104, %105 : vector<8x32xf32>
    %107 = vector.extract_strided_slice %87 {offsets = [0, 96], sizes = [8, 32], strides = [1, 1]} : vector<8x128xf32> to vector<8x32xf32>
    %108 = arith.addf %107, %39 : vector<8x32xf32>
    %109 = arith.mulf %95, %108 : vector<8x32xf32>
    %110 = arith.addf %106, %109 : vector<8x32xf32>
    %111 = math.tanh %110 : vector<8x32xf32>
    %cst_30 = arith.constant 1.000000e+00 : f32
    %112 = vector.broadcast %cst_30 : f32 to vector<8x32xf32>
    %113 = arith.subf %112, %103 : vector<8x32xf32>
    %114 = arith.mulf %113, %85 : vector<8x32xf32>
    %115 = arith.mulf %103, %111 : vector<8x32xf32>
    %116 = arith.addf %114, %115 : vector<8x32xf32>
    %117 = vector.extract_strided_slice %80 {offsets = [0, 8], sizes = [8, 1], strides = [1, 1]} : vector<8x9xf32> to vector<8x1xf32>
    %118 = vector.broadcast %117 : vector<8x1xf32> to vector<8x32xf32>
    %119 = arith.mulf %118, %116 : vector<8x32xf32>
    %120 = arith.addf %78, %119 : vector<8x32xf32>
    %c2 = arith.constant 2 : index
    %c0_31 = arith.constant 0 : index
    %c0_32 = arith.constant 0 : index
    %121 = vector.load %arg2[%c2, %c0_31, %c0_32] : memref<8x8x9xf32, #tpu.memory_space<vmem>>, vector<1x8x9xf32>
    %122 = vector.shape_cast %121 : vector<1x8x9xf32> to vector<8x9xf32>
    %c2_33 = arith.constant 2 : index
    %c0_34 = arith.constant 0 : index
    %c0_35 = arith.constant 0 : index
    %123 = vector.load %arg1[%c2_33, %c0_34, %c0_35] : memref<8x8x96xf32, #tpu.memory_space<vmem>>, vector<1x8x96xf32>
    %124 = vector.shape_cast %123 : vector<1x8x96xf32> to vector<8x96xf32>
    %125 = vector.extract_strided_slice %122 {offsets = [0, 0], sizes = [8, 1], strides = [1, 1]} : vector<8x9xf32> to vector<8x1xf32>
    %126 = vector.broadcast %125 : vector<8x1xf32> to vector<8x32xf32>
    %127 = arith.mulf %126, %74 : vector<8x32xf32>
    %128 = vector.extract_strided_slice %122 {offsets = [0, 1], sizes = [8, 1], strides = [1, 1]} : vector<8x9xf32> to vector<8x1xf32>
    %129 = vector.broadcast %128 : vector<8x1xf32> to vector<8x32xf32>
    %130 = arith.mulf %129, %116 : vector<8x32xf32>
    %131 = arith.addf %127, %130 : vector<8x32xf32>
    %132 = arith.truncf %131 : vector<8x32xf32> to vector<8x32xbf16>
    %cst_36 = arith.constant dense<0.000000e+00> : vector<8x128xf32>
    %133 = tpu.matmul %132, %1, %cst_36 {dimension_numbers = #tpu.dot_dimension_numbers<[1], [0], [0], [1], [0, 0, 1, 1], [], []>} : vector<8x32xbf16>, vector<32x128xbf16>, vector<8x128xf32> -> vector<8x128xf32>
    %134 = vector.extract_strided_slice %124 {offsets = [0, 0], sizes = [8, 32], strides = [1, 1]} : vector<8x96xf32> to vector<8x32xf32>
    %135 = vector.extract_strided_slice %133 {offsets = [0, 0], sizes = [8, 32], strides = [1, 1]} : vector<8x128xf32> to vector<8x32xf32>
    %136 = arith.addf %134, %135 : vector<8x32xf32>
    %137 = arith.negf %136 : vector<8x32xf32>
    %138 = math.exp %137 : vector<8x32xf32>
    %cst_37 = arith.constant 1.000000e+00 : f32
    %139 = vector.broadcast %cst_37 : f32 to vector<8x32xf32>
    %140 = arith.addf %139, %138 : vector<8x32xf32>
    %141 = arith.divf %139, %140 : vector<8x32xf32>
    %142 = vector.extract_strided_slice %124 {offsets = [0, 32], sizes = [8, 32], strides = [1, 1]} : vector<8x96xf32> to vector<8x32xf32>
    %143 = vector.extract_strided_slice %133 {offsets = [0, 32], sizes = [8, 32], strides = [1, 1]} : vector<8x128xf32> to vector<8x32xf32>
    %144 = arith.addf %142, %143 : vector<8x32xf32>
    %145 = arith.negf %144 : vector<8x32xf32>
    %146 = math.exp %145 : vector<8x32xf32>
    %cst_38 = arith.constant 1.000000e+00 : f32
    %147 = vector.broadcast %cst_38 : f32 to vector<8x32xf32>
    %148 = arith.addf %147, %146 : vector<8x32xf32>
    %149 = arith.divf %147, %148 : vector<8x32xf32>
    %150 = vector.extract_strided_slice %124 {offsets = [0, 64], sizes = [8, 32], strides = [1, 1]} : vector<8x96xf32> to vector<8x32xf32>
    %151 = vector.extract_strided_slice %133 {offsets = [0, 64], sizes = [8, 32], strides = [1, 1]} : vector<8x128xf32> to vector<8x32xf32>
    %152 = arith.addf %150, %151 : vector<8x32xf32>
    %153 = vector.extract_strided_slice %133 {offsets = [0, 96], sizes = [8, 32], strides = [1, 1]} : vector<8x128xf32> to vector<8x32xf32>
    %154 = arith.addf %153, %39 : vector<8x32xf32>
    %155 = arith.mulf %141, %154 : vector<8x32xf32>
    %156 = arith.addf %152, %155 : vector<8x32xf32>
    %157 = math.tanh %156 : vector<8x32xf32>
    %cst_39 = arith.constant 1.000000e+00 : f32
    %158 = vector.broadcast %cst_39 : f32 to vector<8x32xf32>
    %159 = arith.subf %158, %149 : vector<8x32xf32>
    %160 = arith.mulf %159, %131 : vector<8x32xf32>
    %161 = arith.mulf %149, %157 : vector<8x32xf32>
    %162 = arith.addf %160, %161 : vector<8x32xf32>
    %163 = vector.extract_strided_slice %122 {offsets = [0, 8], sizes = [8, 1], strides = [1, 1]} : vector<8x9xf32> to vector<8x1xf32>
    %164 = vector.broadcast %163 : vector<8x1xf32> to vector<8x32xf32>
    %165 = arith.mulf %164, %162 : vector<8x32xf32>
    %166 = arith.addf %120, %165 : vector<8x32xf32>
    %c3 = arith.constant 3 : index
    %c0_40 = arith.constant 0 : index
    %c0_41 = arith.constant 0 : index
    %167 = vector.load %arg2[%c3, %c0_40, %c0_41] : memref<8x8x9xf32, #tpu.memory_space<vmem>>, vector<1x8x9xf32>
    %168 = vector.shape_cast %167 : vector<1x8x9xf32> to vector<8x9xf32>
    %c3_42 = arith.constant 3 : index
    %c0_43 = arith.constant 0 : index
    %c0_44 = arith.constant 0 : index
    %169 = vector.load %arg1[%c3_42, %c0_43, %c0_44] : memref<8x8x96xf32, #tpu.memory_space<vmem>>, vector<1x8x96xf32>
    %170 = vector.shape_cast %169 : vector<1x8x96xf32> to vector<8x96xf32>
    %171 = vector.extract_strided_slice %168 {offsets = [0, 0], sizes = [8, 1], strides = [1, 1]} : vector<8x9xf32> to vector<8x1xf32>
    %172 = vector.broadcast %171 : vector<8x1xf32> to vector<8x32xf32>
    %173 = arith.mulf %172, %74 : vector<8x32xf32>
    %174 = vector.extract_strided_slice %168 {offsets = [0, 1], sizes = [8, 1], strides = [1, 1]} : vector<8x9xf32> to vector<8x1xf32>
    %175 = vector.broadcast %174 : vector<8x1xf32> to vector<8x32xf32>
    %176 = arith.mulf %175, %116 : vector<8x32xf32>
    %177 = arith.addf %173, %176 : vector<8x32xf32>
    %178 = vector.extract_strided_slice %168 {offsets = [0, 2], sizes = [8, 1], strides = [1, 1]} : vector<8x9xf32> to vector<8x1xf32>
    %179 = vector.broadcast %178 : vector<8x1xf32> to vector<8x32xf32>
    %180 = arith.mulf %179, %162 : vector<8x32xf32>
    %181 = arith.addf %177, %180 : vector<8x32xf32>
    %182 = arith.truncf %181 : vector<8x32xf32> to vector<8x32xbf16>
    %cst_45 = arith.constant dense<0.000000e+00> : vector<8x128xf32>
    %183 = tpu.matmul %182, %1, %cst_45 {dimension_numbers = #tpu.dot_dimension_numbers<[1], [0], [0], [1], [0, 0, 1, 1], [], []>} : vector<8x32xbf16>, vector<32x128xbf16>, vector<8x128xf32> -> vector<8x128xf32>
    %184 = vector.extract_strided_slice %170 {offsets = [0, 0], sizes = [8, 32], strides = [1, 1]} : vector<8x96xf32> to vector<8x32xf32>
    %185 = vector.extract_strided_slice %183 {offsets = [0, 0], sizes = [8, 32], strides = [1, 1]} : vector<8x128xf32> to vector<8x32xf32>
    %186 = arith.addf %184, %185 : vector<8x32xf32>
    %187 = arith.negf %186 : vector<8x32xf32>
    %188 = math.exp %187 : vector<8x32xf32>
    %cst_46 = arith.constant 1.000000e+00 : f32
    %189 = vector.broadcast %cst_46 : f32 to vector<8x32xf32>
    %190 = arith.addf %189, %188 : vector<8x32xf32>
    %191 = arith.divf %189, %190 : vector<8x32xf32>
    %192 = vector.extract_strided_slice %170 {offsets = [0, 32], sizes = [8, 32], strides = [1, 1]} : vector<8x96xf32> to vector<8x32xf32>
    %193 = vector.extract_strided_slice %183 {offsets = [0, 32], sizes = [8, 32], strides = [1, 1]} : vector<8x128xf32> to vector<8x32xf32>
    %194 = arith.addf %192, %193 : vector<8x32xf32>
    %195 = arith.negf %194 : vector<8x32xf32>
    %196 = math.exp %195 : vector<8x32xf32>
    %cst_47 = arith.constant 1.000000e+00 : f32
    %197 = vector.broadcast %cst_47 : f32 to vector<8x32xf32>
    %198 = arith.addf %197, %196 : vector<8x32xf32>
    %199 = arith.divf %197, %198 : vector<8x32xf32>
    %200 = vector.extract_strided_slice %170 {offsets = [0, 64], sizes = [8, 32], strides = [1, 1]} : vector<8x96xf32> to vector<8x32xf32>
    %201 = vector.extract_strided_slice %183 {offsets = [0, 64], sizes = [8, 32], strides = [1, 1]} : vector<8x128xf32> to vector<8x32xf32>
    %202 = arith.addf %200, %201 : vector<8x32xf32>
    %203 = vector.extract_strided_slice %183 {offsets = [0, 96], sizes = [8, 32], strides = [1, 1]} : vector<8x128xf32> to vector<8x32xf32>
    %204 = arith.addf %203, %39 : vector<8x32xf32>
    %205 = arith.mulf %191, %204 : vector<8x32xf32>
    %206 = arith.addf %202, %205 : vector<8x32xf32>
    %207 = math.tanh %206 : vector<8x32xf32>
    %cst_48 = arith.constant 1.000000e+00 : f32
    %208 = vector.broadcast %cst_48 : f32 to vector<8x32xf32>
    %209 = arith.subf %208, %199 : vector<8x32xf32>
    %210 = arith.mulf %209, %181 : vector<8x32xf32>
    %211 = arith.mulf %199, %207 : vector<8x32xf32>
    %212 = arith.addf %210, %211 : vector<8x32xf32>
    %213 = vector.extract_strided_slice %168 {offsets = [0, 8], sizes = [8, 1], strides = [1, 1]} : vector<8x9xf32> to vector<8x1xf32>
    %214 = vector.broadcast %213 : vector<8x1xf32> to vector<8x32xf32>
    %215 = arith.mulf %214, %212 : vector<8x32xf32>
    %216 = arith.addf %166, %215 : vector<8x32xf32>
    %c4 = arith.constant 4 : index
    %c0_49 = arith.constant 0 : index
    %c0_50 = arith.constant 0 : index
    %217 = vector.load %arg2[%c4, %c0_49, %c0_50] : memref<8x8x9xf32, #tpu.memory_space<vmem>>, vector<1x8x9xf32>
    %218 = vector.shape_cast %217 : vector<1x8x9xf32> to vector<8x9xf32>
    %c4_51 = arith.constant 4 : index
    %c0_52 = arith.constant 0 : index
    %c0_53 = arith.constant 0 : index
    %219 = vector.load %arg1[%c4_51, %c0_52, %c0_53] : memref<8x8x96xf32, #tpu.memory_space<vmem>>, vector<1x8x96xf32>
    %220 = vector.shape_cast %219 : vector<1x8x96xf32> to vector<8x96xf32>
    %221 = vector.extract_strided_slice %218 {offsets = [0, 0], sizes = [8, 1], strides = [1, 1]} : vector<8x9xf32> to vector<8x1xf32>
    %222 = vector.broadcast %221 : vector<8x1xf32> to vector<8x32xf32>
    %223 = arith.mulf %222, %74 : vector<8x32xf32>
    %224 = vector.extract_strided_slice %218 {offsets = [0, 1], sizes = [8, 1], strides = [1, 1]} : vector<8x9xf32> to vector<8x1xf32>
    %225 = vector.broadcast %224 : vector<8x1xf32> to vector<8x32xf32>
    %226 = arith.mulf %225, %116 : vector<8x32xf32>
    %227 = arith.addf %223, %226 : vector<8x32xf32>
    %228 = vector.extract_strided_slice %218 {offsets = [0, 2], sizes = [8, 1], strides = [1, 1]} : vector<8x9xf32> to vector<8x1xf32>
    %229 = vector.broadcast %228 : vector<8x1xf32> to vector<8x32xf32>
    %230 = arith.mulf %229, %162 : vector<8x32xf32>
    %231 = arith.addf %227, %230 : vector<8x32xf32>
    %232 = vector.extract_strided_slice %218 {offsets = [0, 3], sizes = [8, 1], strides = [1, 1]} : vector<8x9xf32> to vector<8x1xf32>
    %233 = vector.broadcast %232 : vector<8x1xf32> to vector<8x32xf32>
    %234 = arith.mulf %233, %212 : vector<8x32xf32>
    %235 = arith.addf %231, %234 : vector<8x32xf32>
    %236 = arith.truncf %235 : vector<8x32xf32> to vector<8x32xbf16>
    %cst_54 = arith.constant dense<0.000000e+00> : vector<8x128xf32>
    %237 = tpu.matmul %236, %1, %cst_54 {dimension_numbers = #tpu.dot_dimension_numbers<[1], [0], [0], [1], [0, 0, 1, 1], [], []>} : vector<8x32xbf16>, vector<32x128xbf16>, vector<8x128xf32> -> vector<8x128xf32>
    %238 = vector.extract_strided_slice %220 {offsets = [0, 0], sizes = [8, 32], strides = [1, 1]} : vector<8x96xf32> to vector<8x32xf32>
    %239 = vector.extract_strided_slice %237 {offsets = [0, 0], sizes = [8, 32], strides = [1, 1]} : vector<8x128xf32> to vector<8x32xf32>
    %240 = arith.addf %238, %239 : vector<8x32xf32>
    %241 = arith.negf %240 : vector<8x32xf32>
    %242 = math.exp %241 : vector<8x32xf32>
    %cst_55 = arith.constant 1.000000e+00 : f32
    %243 = vector.broadcast %cst_55 : f32 to vector<8x32xf32>
    %244 = arith.addf %243, %242 : vector<8x32xf32>
    %245 = arith.divf %243, %244 : vector<8x32xf32>
    %246 = vector.extract_strided_slice %220 {offsets = [0, 32], sizes = [8, 32], strides = [1, 1]} : vector<8x96xf32> to vector<8x32xf32>
    %247 = vector.extract_strided_slice %237 {offsets = [0, 32], sizes = [8, 32], strides = [1, 1]} : vector<8x128xf32> to vector<8x32xf32>
    %248 = arith.addf %246, %247 : vector<8x32xf32>
    %249 = arith.negf %248 : vector<8x32xf32>
    %250 = math.exp %249 : vector<8x32xf32>
    %cst_56 = arith.constant 1.000000e+00 : f32
    %251 = vector.broadcast %cst_56 : f32 to vector<8x32xf32>
    %252 = arith.addf %251, %250 : vector<8x32xf32>
    %253 = arith.divf %251, %252 : vector<8x32xf32>
    %254 = vector.extract_strided_slice %220 {offsets = [0, 64], sizes = [8, 32], strides = [1, 1]} : vector<8x96xf32> to vector<8x32xf32>
    %255 = vector.extract_strided_slice %237 {offsets = [0, 64], sizes = [8, 32], strides = [1, 1]} : vector<8x128xf32> to vector<8x32xf32>
    %256 = arith.addf %254, %255 : vector<8x32xf32>
    %257 = vector.extract_strided_slice %237 {offsets = [0, 96], sizes = [8, 32], strides = [1, 1]} : vector<8x128xf32> to vector<8x32xf32>
    %258 = arith.addf %257, %39 : vector<8x32xf32>
    %259 = arith.mulf %245, %258 : vector<8x32xf32>
    %260 = arith.addf %256, %259 : vector<8x32xf32>
    %261 = math.tanh %260 : vector<8x32xf32>
    %cst_57 = arith.constant 1.000000e+00 : f32
    %262 = vector.broadcast %cst_57 : f32 to vector<8x32xf32>
    %263 = arith.subf %262, %253 : vector<8x32xf32>
    %264 = arith.mulf %263, %235 : vector<8x32xf32>
    %265 = arith.mulf %253, %261 : vector<8x32xf32>
    %266 = arith.addf %264, %265 : vector<8x32xf32>
    %267 = vector.extract_strided_slice %218 {offsets = [0, 8], sizes = [8, 1], strides = [1, 1]} : vector<8x9xf32> to vector<8x1xf32>
    %268 = vector.broadcast %267 : vector<8x1xf32> to vector<8x32xf32>
    %269 = arith.mulf %268, %266 : vector<8x32xf32>
    %270 = arith.addf %216, %269 : vector<8x32xf32>
    %c5 = arith.constant 5 : index
    %c0_58 = arith.constant 0 : index
    %c0_59 = arith.constant 0 : index
    %271 = vector.load %arg2[%c5, %c0_58, %c0_59] : memref<8x8x9xf32, #tpu.memory_space<vmem>>, vector<1x8x9xf32>
    %272 = vector.shape_cast %271 : vector<1x8x9xf32> to vector<8x9xf32>
    %c5_60 = arith.constant 5 : index
    %c0_61 = arith.constant 0 : index
    %c0_62 = arith.constant 0 : index
    %273 = vector.load %arg1[%c5_60, %c0_61, %c0_62] : memref<8x8x96xf32, #tpu.memory_space<vmem>>, vector<1x8x96xf32>
    %274 = vector.shape_cast %273 : vector<1x8x96xf32> to vector<8x96xf32>
    %275 = vector.extract_strided_slice %272 {offsets = [0, 0], sizes = [8, 1], strides = [1, 1]} : vector<8x9xf32> to vector<8x1xf32>
    %276 = vector.broadcast %275 : vector<8x1xf32> to vector<8x32xf32>
    %277 = arith.mulf %276, %74 : vector<8x32xf32>
    %278 = vector.extract_strided_slice %272 {offsets = [0, 1], sizes = [8, 1], strides = [1, 1]} : vector<8x9xf32> to vector<8x1xf32>
    %279 = vector.broadcast %278 : vector<8x1xf32> to vector<8x32xf32>
    %280 = arith.mulf %279, %116 : vector<8x32xf32>
    %281 = arith.addf %277, %280 : vector<8x32xf32>
    %282 = vector.extract_strided_slice %272 {offsets = [0, 2], sizes = [8, 1], strides = [1, 1]} : vector<8x9xf32> to vector<8x1xf32>
    %283 = vector.broadcast %282 : vector<8x1xf32> to vector<8x32xf32>
    %284 = arith.mulf %283, %162 : vector<8x32xf32>
    %285 = arith.addf %281, %284 : vector<8x32xf32>
    %286 = vector.extract_strided_slice %272 {offsets = [0, 3], sizes = [8, 1], strides = [1, 1]} : vector<8x9xf32> to vector<8x1xf32>
    %287 = vector.broadcast %286 : vector<8x1xf32> to vector<8x32xf32>
    %288 = arith.mulf %287, %212 : vector<8x32xf32>
    %289 = arith.addf %285, %288 : vector<8x32xf32>
    %290 = vector.extract_strided_slice %272 {offsets = [0, 4], sizes = [8, 1], strides = [1, 1]} : vector<8x9xf32> to vector<8x1xf32>
    %291 = vector.broadcast %290 : vector<8x1xf32> to vector<8x32xf32>
    %292 = arith.mulf %291, %266 : vector<8x32xf32>
    %293 = arith.addf %289, %292 : vector<8x32xf32>
    %294 = arith.truncf %293 : vector<8x32xf32> to vector<8x32xbf16>
    %cst_63 = arith.constant dense<0.000000e+00> : vector<8x128xf32>
    %295 = tpu.matmul %294, %1, %cst_63 {dimension_numbers = #tpu.dot_dimension_numbers<[1], [0], [0], [1], [0, 0, 1, 1], [], []>} : vector<8x32xbf16>, vector<32x128xbf16>, vector<8x128xf32> -> vector<8x128xf32>
    %296 = vector.extract_strided_slice %274 {offsets = [0, 0], sizes = [8, 32], strides = [1, 1]} : vector<8x96xf32> to vector<8x32xf32>
    %297 = vector.extract_strided_slice %295 {offsets = [0, 0], sizes = [8, 32], strides = [1, 1]} : vector<8x128xf32> to vector<8x32xf32>
    %298 = arith.addf %296, %297 : vector<8x32xf32>
    %299 = arith.negf %298 : vector<8x32xf32>
    %300 = math.exp %299 : vector<8x32xf32>
    %cst_64 = arith.constant 1.000000e+00 : f32
    %301 = vector.broadcast %cst_64 : f32 to vector<8x32xf32>
    %302 = arith.addf %301, %300 : vector<8x32xf32>
    %303 = arith.divf %301, %302 : vector<8x32xf32>
    %304 = vector.extract_strided_slice %274 {offsets = [0, 32], sizes = [8, 32], strides = [1, 1]} : vector<8x96xf32> to vector<8x32xf32>
    %305 = vector.extract_strided_slice %295 {offsets = [0, 32], sizes = [8, 32], strides = [1, 1]} : vector<8x128xf32> to vector<8x32xf32>
    %306 = arith.addf %304, %305 : vector<8x32xf32>
    %307 = arith.negf %306 : vector<8x32xf32>
    %308 = math.exp %307 : vector<8x32xf32>
    %cst_65 = arith.constant 1.000000e+00 : f32
    %309 = vector.broadcast %cst_65 : f32 to vector<8x32xf32>
    %310 = arith.addf %309, %308 : vector<8x32xf32>
    %311 = arith.divf %309, %310 : vector<8x32xf32>
    %312 = vector.extract_strided_slice %274 {offsets = [0, 64], sizes = [8, 32], strides = [1, 1]} : vector<8x96xf32> to vector<8x32xf32>
    %313 = vector.extract_strided_slice %295 {offsets = [0, 64], sizes = [8, 32], strides = [1, 1]} : vector<8x128xf32> to vector<8x32xf32>
    %314 = arith.addf %312, %313 : vector<8x32xf32>
    %315 = vector.extract_strided_slice %295 {offsets = [0, 96], sizes = [8, 32], strides = [1, 1]} : vector<8x128xf32> to vector<8x32xf32>
    %316 = arith.addf %315, %39 : vector<8x32xf32>
    %317 = arith.mulf %303, %316 : vector<8x32xf32>
    %318 = arith.addf %314, %317 : vector<8x32xf32>
    %319 = math.tanh %318 : vector<8x32xf32>
    %cst_66 = arith.constant 1.000000e+00 : f32
    %320 = vector.broadcast %cst_66 : f32 to vector<8x32xf32>
    %321 = arith.subf %320, %311 : vector<8x32xf32>
    %322 = arith.mulf %321, %293 : vector<8x32xf32>
    %323 = arith.mulf %311, %319 : vector<8x32xf32>
    %324 = arith.addf %322, %323 : vector<8x32xf32>
    %325 = vector.extract_strided_slice %272 {offsets = [0, 8], sizes = [8, 1], strides = [1, 1]} : vector<8x9xf32> to vector<8x1xf32>
    %326 = vector.broadcast %325 : vector<8x1xf32> to vector<8x32xf32>
    %327 = arith.mulf %326, %324 : vector<8x32xf32>
    %328 = arith.addf %270, %327 : vector<8x32xf32>
    %c6 = arith.constant 6 : index
    %c0_67 = arith.constant 0 : index
    %c0_68 = arith.constant 0 : index
    %329 = vector.load %arg2[%c6, %c0_67, %c0_68] : memref<8x8x9xf32, #tpu.memory_space<vmem>>, vector<1x8x9xf32>
    %330 = vector.shape_cast %329 : vector<1x8x9xf32> to vector<8x9xf32>
    %c6_69 = arith.constant 6 : index
    %c0_70 = arith.constant 0 : index
    %c0_71 = arith.constant 0 : index
    %331 = vector.load %arg1[%c6_69, %c0_70, %c0_71] : memref<8x8x96xf32, #tpu.memory_space<vmem>>, vector<1x8x96xf32>
    %332 = vector.shape_cast %331 : vector<1x8x96xf32> to vector<8x96xf32>
    %333 = vector.extract_strided_slice %330 {offsets = [0, 0], sizes = [8, 1], strides = [1, 1]} : vector<8x9xf32> to vector<8x1xf32>
    %334 = vector.broadcast %333 : vector<8x1xf32> to vector<8x32xf32>
    %335 = arith.mulf %334, %74 : vector<8x32xf32>
    %336 = vector.extract_strided_slice %330 {offsets = [0, 1], sizes = [8, 1], strides = [1, 1]} : vector<8x9xf32> to vector<8x1xf32>
    %337 = vector.broadcast %336 : vector<8x1xf32> to vector<8x32xf32>
    %338 = arith.mulf %337, %116 : vector<8x32xf32>
    %339 = arith.addf %335, %338 : vector<8x32xf32>
    %340 = vector.extract_strided_slice %330 {offsets = [0, 2], sizes = [8, 1], strides = [1, 1]} : vector<8x9xf32> to vector<8x1xf32>
    %341 = vector.broadcast %340 : vector<8x1xf32> to vector<8x32xf32>
    %342 = arith.mulf %341, %162 : vector<8x32xf32>
    %343 = arith.addf %339, %342 : vector<8x32xf32>
    %344 = vector.extract_strided_slice %330 {offsets = [0, 3], sizes = [8, 1], strides = [1, 1]} : vector<8x9xf32> to vector<8x1xf32>
    %345 = vector.broadcast %344 : vector<8x1xf32> to vector<8x32xf32>
    %346 = arith.mulf %345, %212 : vector<8x32xf32>
    %347 = arith.addf %343, %346 : vector<8x32xf32>
    %348 = vector.extract_strided_slice %330 {offsets = [0, 4], sizes = [8, 1], strides = [1, 1]} : vector<8x9xf32> to vector<8x1xf32>
    %349 = vector.broadcast %348 : vector<8x1xf32> to vector<8x32xf32>
    %350 = arith.mulf %349, %266 : vector<8x32xf32>
    %351 = arith.addf %347, %350 : vector<8x32xf32>
    %352 = vector.extract_strided_slice %330 {offsets = [0, 5], sizes = [8, 1], strides = [1, 1]} : vector<8x9xf32> to vector<8x1xf32>
    %353 = vector.broadcast %352 : vector<8x1xf32> to vector<8x32xf32>
    %354 = arith.mulf %353, %324 : vector<8x32xf32>
    %355 = arith.addf %351, %354 : vector<8x32xf32>
    %356 = arith.truncf %355 : vector<8x32xf32> to vector<8x32xbf16>
    %cst_72 = arith.constant dense<0.000000e+00> : vector<8x128xf32>
    %357 = tpu.matmul %356, %1, %cst_72 {dimension_numbers = #tpu.dot_dimension_numbers<[1], [0], [0], [1], [0, 0, 1, 1], [], []>} : vector<8x32xbf16>, vector<32x128xbf16>, vector<8x128xf32> -> vector<8x128xf32>
    %358 = vector.extract_strided_slice %332 {offsets = [0, 0], sizes = [8, 32], strides = [1, 1]} : vector<8x96xf32> to vector<8x32xf32>
    %359 = vector.extract_strided_slice %357 {offsets = [0, 0], sizes = [8, 32], strides = [1, 1]} : vector<8x128xf32> to vector<8x32xf32>
    %360 = arith.addf %358, %359 : vector<8x32xf32>
    %361 = arith.negf %360 : vector<8x32xf32>
    %362 = math.exp %361 : vector<8x32xf32>
    %cst_73 = arith.constant 1.000000e+00 : f32
    %363 = vector.broadcast %cst_73 : f32 to vector<8x32xf32>
    %364 = arith.addf %363, %362 : vector<8x32xf32>
    %365 = arith.divf %363, %364 : vector<8x32xf32>
    %366 = vector.extract_strided_slice %332 {offsets = [0, 32], sizes = [8, 32], strides = [1, 1]} : vector<8x96xf32> to vector<8x32xf32>
    %367 = vector.extract_strided_slice %357 {offsets = [0, 32], sizes = [8, 32], strides = [1, 1]} : vector<8x128xf32> to vector<8x32xf32>
    %368 = arith.addf %366, %367 : vector<8x32xf32>
    %369 = arith.negf %368 : vector<8x32xf32>
    %370 = math.exp %369 : vector<8x32xf32>
    %cst_74 = arith.constant 1.000000e+00 : f32
    %371 = vector.broadcast %cst_74 : f32 to vector<8x32xf32>
    %372 = arith.addf %371, %370 : vector<8x32xf32>
    %373 = arith.divf %371, %372 : vector<8x32xf32>
    %374 = vector.extract_strided_slice %332 {offsets = [0, 64], sizes = [8, 32], strides = [1, 1]} : vector<8x96xf32> to vector<8x32xf32>
    %375 = vector.extract_strided_slice %357 {offsets = [0, 64], sizes = [8, 32], strides = [1, 1]} : vector<8x128xf32> to vector<8x32xf32>
    %376 = arith.addf %374, %375 : vector<8x32xf32>
    %377 = vector.extract_strided_slice %357 {offsets = [0, 96], sizes = [8, 32], strides = [1, 1]} : vector<8x128xf32> to vector<8x32xf32>
    %378 = arith.addf %377, %39 : vector<8x32xf32>
    %379 = arith.mulf %365, %378 : vector<8x32xf32>
    %380 = arith.addf %376, %379 : vector<8x32xf32>
    %381 = math.tanh %380 : vector<8x32xf32>
    %cst_75 = arith.constant 1.000000e+00 : f32
    %382 = vector.broadcast %cst_75 : f32 to vector<8x32xf32>
    %383 = arith.subf %382, %373 : vector<8x32xf32>
    %384 = arith.mulf %383, %355 : vector<8x32xf32>
    %385 = arith.mulf %373, %381 : vector<8x32xf32>
    %386 = arith.addf %384, %385 : vector<8x32xf32>
    %387 = vector.extract_strided_slice %330 {offsets = [0, 8], sizes = [8, 1], strides = [1, 1]} : vector<8x9xf32> to vector<8x1xf32>
    %388 = vector.broadcast %387 : vector<8x1xf32> to vector<8x32xf32>
    %389 = arith.mulf %388, %386 : vector<8x32xf32>
    %390 = arith.addf %328, %389 : vector<8x32xf32>
    %c7 = arith.constant 7 : index
    %c0_76 = arith.constant 0 : index
    %c0_77 = arith.constant 0 : index
    %391 = vector.load %arg2[%c7, %c0_76, %c0_77] : memref<8x8x9xf32, #tpu.memory_space<vmem>>, vector<1x8x9xf32>
    %392 = vector.shape_cast %391 : vector<1x8x9xf32> to vector<8x9xf32>
    %c7_78 = arith.constant 7 : index
    %c0_79 = arith.constant 0 : index
    %c0_80 = arith.constant 0 : index
    %393 = vector.load %arg1[%c7_78, %c0_79, %c0_80] : memref<8x8x96xf32, #tpu.memory_space<vmem>>, vector<1x8x96xf32>
    %394 = vector.shape_cast %393 : vector<1x8x96xf32> to vector<8x96xf32>
    %395 = vector.extract_strided_slice %392 {offsets = [0, 0], sizes = [8, 1], strides = [1, 1]} : vector<8x9xf32> to vector<8x1xf32>
    %396 = vector.broadcast %395 : vector<8x1xf32> to vector<8x32xf32>
    %397 = arith.mulf %396, %74 : vector<8x32xf32>
    %398 = vector.extract_strided_slice %392 {offsets = [0, 1], sizes = [8, 1], strides = [1, 1]} : vector<8x9xf32> to vector<8x1xf32>
    %399 = vector.broadcast %398 : vector<8x1xf32> to vector<8x32xf32>
    %400 = arith.mulf %399, %116 : vector<8x32xf32>
    %401 = arith.addf %397, %400 : vector<8x32xf32>
    %402 = vector.extract_strided_slice %392 {offsets = [0, 2], sizes = [8, 1], strides = [1, 1]} : vector<8x9xf32> to vector<8x1xf32>
    %403 = vector.broadcast %402 : vector<8x1xf32> to vector<8x32xf32>
    %404 = arith.mulf %403, %162 : vector<8x32xf32>
    %405 = arith.addf %401, %404 : vector<8x32xf32>
    %406 = vector.extract_strided_slice %392 {offsets = [0, 3], sizes = [8, 1], strides = [1, 1]} : vector<8x9xf32> to vector<8x1xf32>
    %407 = vector.broadcast %406 : vector<8x1xf32> to vector<8x32xf32>
    %408 = arith.mulf %407, %212 : vector<8x32xf32>
    %409 = arith.addf %405, %408 : vector<8x32xf32>
    %410 = vector.extract_strided_slice %392 {offsets = [0, 4], sizes = [8, 1], strides = [1, 1]} : vector<8x9xf32> to vector<8x1xf32>
    %411 = vector.broadcast %410 : vector<8x1xf32> to vector<8x32xf32>
    %412 = arith.mulf %411, %266 : vector<8x32xf32>
    %413 = arith.addf %409, %412 : vector<8x32xf32>
    %414 = vector.extract_strided_slice %392 {offsets = [0, 5], sizes = [8, 1], strides = [1, 1]} : vector<8x9xf32> to vector<8x1xf32>
    %415 = vector.broadcast %414 : vector<8x1xf32> to vector<8x32xf32>
    %416 = arith.mulf %415, %324 : vector<8x32xf32>
    %417 = arith.addf %413, %416 : vector<8x32xf32>
    %418 = vector.extract_strided_slice %392 {offsets = [0, 6], sizes = [8, 1], strides = [1, 1]} : vector<8x9xf32> to vector<8x1xf32>
    %419 = vector.broadcast %418 : vector<8x1xf32> to vector<8x32xf32>
    %420 = arith.mulf %419, %386 : vector<8x32xf32>
    %421 = arith.addf %417, %420 : vector<8x32xf32>
    %422 = arith.truncf %421 : vector<8x32xf32> to vector<8x32xbf16>
    %cst_81 = arith.constant dense<0.000000e+00> : vector<8x128xf32>
    %423 = tpu.matmul %422, %1, %cst_81 {dimension_numbers = #tpu.dot_dimension_numbers<[1], [0], [0], [1], [0, 0, 1, 1], [], []>} : vector<8x32xbf16>, vector<32x128xbf16>, vector<8x128xf32> -> vector<8x128xf32>
    %424 = vector.extract_strided_slice %394 {offsets = [0, 0], sizes = [8, 32], strides = [1, 1]} : vector<8x96xf32> to vector<8x32xf32>
    %425 = vector.extract_strided_slice %423 {offsets = [0, 0], sizes = [8, 32], strides = [1, 1]} : vector<8x128xf32> to vector<8x32xf32>
    %426 = arith.addf %424, %425 : vector<8x32xf32>
    %427 = arith.negf %426 : vector<8x32xf32>
    %428 = math.exp %427 : vector<8x32xf32>
    %cst_82 = arith.constant 1.000000e+00 : f32
    %429 = vector.broadcast %cst_82 : f32 to vector<8x32xf32>
    %430 = arith.addf %429, %428 : vector<8x32xf32>
    %431 = arith.divf %429, %430 : vector<8x32xf32>
    %432 = vector.extract_strided_slice %394 {offsets = [0, 32], sizes = [8, 32], strides = [1, 1]} : vector<8x96xf32> to vector<8x32xf32>
    %433 = vector.extract_strided_slice %423 {offsets = [0, 32], sizes = [8, 32], strides = [1, 1]} : vector<8x128xf32> to vector<8x32xf32>
    %434 = arith.addf %432, %433 : vector<8x32xf32>
    %435 = arith.negf %434 : vector<8x32xf32>
    %436 = math.exp %435 : vector<8x32xf32>
    %cst_83 = arith.constant 1.000000e+00 : f32
    %437 = vector.broadcast %cst_83 : f32 to vector<8x32xf32>
    %438 = arith.addf %437, %436 : vector<8x32xf32>
    %439 = arith.divf %437, %438 : vector<8x32xf32>
    %440 = vector.extract_strided_slice %394 {offsets = [0, 64], sizes = [8, 32], strides = [1, 1]} : vector<8x96xf32> to vector<8x32xf32>
    %441 = vector.extract_strided_slice %423 {offsets = [0, 64], sizes = [8, 32], strides = [1, 1]} : vector<8x128xf32> to vector<8x32xf32>
    %442 = arith.addf %440, %441 : vector<8x32xf32>
    %443 = vector.extract_strided_slice %423 {offsets = [0, 96], sizes = [8, 32], strides = [1, 1]} : vector<8x128xf32> to vector<8x32xf32>
    %444 = arith.addf %443, %39 : vector<8x32xf32>
    %445 = arith.mulf %431, %444 : vector<8x32xf32>
    %446 = arith.addf %442, %445 : vector<8x32xf32>
    %447 = math.tanh %446 : vector<8x32xf32>
    %cst_84 = arith.constant 1.000000e+00 : f32
    %448 = vector.broadcast %cst_84 : f32 to vector<8x32xf32>
    %449 = arith.subf %448, %439 : vector<8x32xf32>
    %450 = arith.mulf %449, %421 : vector<8x32xf32>
    %451 = arith.mulf %439, %447 : vector<8x32xf32>
    %452 = arith.addf %450, %451 : vector<8x32xf32>
    %453 = vector.extract_strided_slice %392 {offsets = [0, 8], sizes = [8, 1], strides = [1, 1]} : vector<8x9xf32> to vector<8x1xf32>
    %454 = vector.broadcast %453 : vector<8x1xf32> to vector<8x32xf32>
    %455 = arith.mulf %454, %452 : vector<8x32xf32>
    %456 = arith.addf %390, %455 : vector<8x32xf32>
    %457 = arith.truncf %456 : vector<8x32xf32> to vector<8x32xbf16>
    %cst_85 = arith.constant dense<0.000000e+00> : vector<8x32xf32>
    %458 = tpu.matmul %457, %3, %cst_85 {dimension_numbers = #tpu.dot_dimension_numbers<[1], [0], [0], [1], [0, 0, 1, 1], [], []>} : vector<8x32xbf16>, vector<32x32xbf16>, vector<8x32xf32> -> vector<8x32xf32>
    %459 = vector.broadcast %8 : vector<1x32xf32> to vector<8x32xf32>
    %460 = arith.addf %458, %459 : vector<8x32xf32>
    %cst_86 = arith.constant 0.000000e+00 : f32
    %461 = vector.broadcast %cst_86 : f32 to vector<8x32xf32>
    %462 = arith.cmpf oge, %460, %461 : vector<8x32xf32>
    %cst_87 = arith.constant 0.00999999977 : f32
    %463 = vector.broadcast %cst_87 : f32 to vector<8x32xf32>
    %464 = arith.mulf %463, %460 : vector<8x32xf32>
    %465 = arith.select %462, %460, %464 : vector<8x32xi1>, vector<8x32xf32>
    %466 = vector.broadcast %9 : vector<1x32xf32> to vector<8x32xf32>
    %467 = arith.mulf %465, %466 : vector<8x32xf32>
    %cst_88 = arith.constant dense<0.000000e+00> : vector<8xf32>
    %468 = vector.multi_reduction <add>, %467, %cst_88 [1] : vector<8x32xf32> to vector<8xf32>
    %469 = vector.shape_cast %468 : vector<8xf32> to vector<8x1xf32>
    %470 = vector.broadcast %10 : vector<1x1xf32> to vector<8x1xf32>
    %471 = arith.addf %469, %470 : vector<8x1xf32>
    %472 = vector.shape_cast %471 : vector<8x1xf32> to vector<8x1xf32>
    %473 = vector.broadcast %472 : vector<8x1xf32> to vector<8x128xf32>
    %c0_89 = arith.constant 0 : index
    %c0_90 = arith.constant 0 : index
    %474 = vector.load %arg6[%c0_89, %c0_90] : memref<8x128xf32, #tpu.memory_space<vmem>>, vector<8x128xf32>
    tpu.vector_store %arg6[%c0_89, %c0_90], %473 {strides = array<i32>} : memref<8x128xf32, #tpu.memory_space<vmem>>, vector<8x128xf32>,
    return
  }
}

</mosaic_0001>

<bundles_post_ra>
// kernel: tpu_custom_call.1
= control target key start
LH: loop header
LB: loop body
LE: loop exit
PB: predicated region body
PF: predicated region fallthrough
CT: control target
= control target key end

     0   :  { %s3160_s0 = inlined_call_operand.vmem [shape: bf16[8,1536], index: 0, kind: input, shape index: {}]   ;;  %s3161_s1 = inlined_call_operand.vmem [shape: f32[8,8,96], index: 1, kind: input, shape index: {}]   ;;  %s3162_s2 = inlined_call_operand.vmem [shape: f32[8,8,9], index: 2, kind: input, shape index: {}]   ;;  %s3163_s3 = inlined_call_operand.vmem [shape: bf16[1536,32], index: 3, kind: input, shape index: {}]   ;;  %s3164_s4 = inlined_call_operand.vmem [shape: bf16[32,256], index: 4, kind: input, shape index: {}]   ;;  %s3165_s5 = inlined_call_operand.vmem [shape: f32[8,128], index: 5, kind: input, shape index: {}]   ;;  %s3166_s6 = inlined_call_operand.hbm [shape: f32[8,128], index: 6, kind: output, shape index: {}]  }
   0x1   :  { %v2302_v0 = vld [vmem:[%s3163_s3 + $0x38] sm:$0xff]  ;;  %v2301_v4 = vld [vmem:[%s3163_s3 + $0x30] sm:$0xff]  ;;  %v2300_v8 = vld [vmem:[%s3163_s3 + $0x28] sm:$0xff] }
   0x2   :  { %v2310_v1 = vld [vmem:[%s3163_s3 + $0x78] sm:$0xff]  ;;  %847 = vmatpush.bf16.msra.mxu0 %v2302_v0  ;;  %v2309_v5 = vld [vmem:[%s3163_s3 + $0x70] sm:$0xff]  ;;  %v2308_v9 = vld [vmem:[%s3163_s3 + $0x68] sm:$0xff] }
   0x3   :  { %v2318_v2 = vld [vmem:[%s3163_s3 + $0xb8] sm:$0xff]  ;;  %860 = vmatpush.bf16.msra.mxu1 %v2310_v1  ;;  %v2317_v6 = vld [vmem:[%s3163_s3 + $0xb0] sm:$0xff]  ;;  %v2316_v10 = vld [vmem:[%s3163_s3 + $0xa8] sm:$0xff] }
   0x4   :  { %v2326_v3 = vld [vmem:[%s3163_s3 + $0xf8] sm:$0xff]  ;;  %873 = vmatpush.bf16.msra.mxu2 %v2318_v2  ;;  %v2325_v7 = vld [vmem:[%s3163_s3 + $0xf0] sm:$0xff]  ;;  %v2324_v11 = vld [vmem:[%s3163_s3 + $0xe8] sm:$0xff] }
   0x5   :  { %886 = vmatpush.bf16.msra.mxu3 %v2326_v3  ;;  %v2299_v12 = vld [vmem:[%s3163_s3 + $0x20] sm:$0xff]  ;;  %v2298_v16 = vld [vmem:[%s3163_s3 + $0x18] sm:$0xff]  ;;  %v2297_v20 = vld [vmem:[%s3163_s3 + $0x10] sm:$0xff] }
   0x6   :  { %848 = vmatpush.bf16.msra.mxu0 %v2301_v4  ;;  %v2307_v13 = vld [vmem:[%s3163_s3 + $0x60] sm:$0xff]  ;;  %v2306_v17 = vld [vmem:[%s3163_s3 + $0x58] sm:$0xff]  ;;  %v2305_v21 = vld [vmem:[%s3163_s3 + $0x50] sm:$0xff] }
   0x7   :  { %861 = vmatpush.bf16.msra.mxu1 %v2309_v5  ;;  %v2315_v14 = vld [vmem:[%s3163_s3 + $0xa0] sm:$0xff]  ;;  %v2314_v18 = vld [vmem:[%s3163_s3 + $0x98] sm:$0xff] }
   0x8   :  { %874 = vmatpush.bf16.msra.mxu2 %v2317_v6  ;;  %v2323_v15 = vld [vmem:[%s3163_s3 + $0xe0] sm:$0xff]  ;;  %v2322_v19 = vld [vmem:[%s3163_s3 + $0xd8] sm:$0xff] }
   0x9   :  { %887 = vmatpush.bf16.msra.mxu3 %v2325_v7 }
   0xa   :  { %849 = vmatpush.bf16.msra.mxu0 %v2300_v8 }
   0xb   :  { %862 = vmatpush.bf16.msra.mxu1 %v2308_v9 }
   0xc   :  { %875 = vmatpush.bf16.msra.mxu2 %v2316_v10 }
   0xd   :  { %888 = vmatpush.bf16.msra.mxu3 %v2324_v11 }
   0xe   :  { %850 = vmatpush.bf16.msra.mxu0 %v2299_v12 }
   0xf   :  { %863 = vmatpush.bf16.msra.mxu1 %v2307_v13 }
  0x10   :  { %876 = vmatpush.bf16.msra.mxu2 %v2315_v14 }
  0x11   :  { %889 = vmatpush.bf16.msra.mxu3 %v2323_v15 }
  0x12   :  { %851 = vmatpush.bf16.msra.mxu0 %v2298_v16 }
  0x13   :  { %864 = vmatpush.bf16.msra.mxu1 %v2306_v17 }
  0x14   :  { %11 = vsyncpa [#allocation3], 0  ;;  %877 = vmatpush.bf16.msra.mxu2 %v2314_v18  ;;  %v2313_v22 = vld [vmem:[%s3163_s3 + $0x90] sm:$0xff]  ;;  %v2296_v24 = vld [vmem:[%s3163_s3 + $0x8] sm:$0xff]  ;;  %vm1003_vm0 = vcmask 261120   ;;  %s2516_s16 = smov 96  }
  0x15   :  { %890 = vmatpush.bf16.msra.mxu3 %v2322_v19  ;;  %v2321_v23 = vld [vmem:[%s3163_s3 + $0xd0] sm:$0xff]  ;;  %v2304_v25 = vld [vmem:[%s3163_s3 + $0x48] sm:$0xff]  ;;  %v30_v29 = vld [vmem:[%s3160_s0] sm:$0xff]  ;;  %s2517_s25 = smov 32   ;;  %s1851_s30 = sshll.u32 %s3166_s6, 4  ;;  %s1852_s30 = int_to_ptr.hbm [resolvable:$true] %s1851_s30 }
  0x16   :  { %852 = vmatpush.bf16.msra.mxu0 %v2297_v20  ;;  %v2312_v26 = vld [vmem:[%s3163_s3 + $0x88] sm:$0xff]  ;;  %v2295_v30 = vld [vmem:[%s3163_s3] sm:$0xff]  ;;  %v235_v33 = vunpack.c.l.b16 %v30_v29  ;;  %v236_v37 = vunpack.c.h.b16 %v30_v29  ;;  %v2334_v38 = vld [vmem:[%s3163_s3 + $0x138] sm:$0xff] }
  0x17   :  { %865 = vmatpush.bf16.msra.mxu1 %v2305_v21  ;;  %v2320_v27 = vld [vmem:[%s3163_s3 + $0xc8] sm:$0xff]  ;;  %v2303_v31 = vld [vmem:[%s3163_s3 + $0x40] sm:$0xff]  ;;  %v2342_v39 = vld [vmem:[%s3163_s3 + $0x178] sm:$0xff] }
  0x18   :  { %878 = vmatpush.bf16.msra.mxu2 %v2313_v22  ;;  %v31_v28 = vld [vmem:[%s3160_s0 + $0x8] sm:$0xff]  ;;  %v2311_v34 = vld [vmem:[%s3163_s3 + $0x80] sm:$0xff]  ;;  %v2350_v40 = vld [vmem:[%s3163_s3 + $0x1b8] sm:$0xff]  ;;  %v247_v43 = vpack.c.b16 %v235_v33, %v235_v33  ;;  %v248_v45 = vpack.c.b16 %v236_v37, %v236_v37 }
  0x19   :  { %891 = vmatpush.bf16.msra.mxu3 %v2321_v23  ;;  %v237_v32 = vunpack.c.l.b16 %v31_v28  ;;  %v2319_v35 = vld [vmem:[%s3163_s3 + $0xc0] sm:$0xff]  ;;  %v238_v36 = vunpack.c.h.b16 %v31_v28  ;;  %v2358_v41 = vld [vmem:[%s3163_s3 + $0x1f8] sm:$0xff]  ;;  %v2333_v46 = vld [vmem:[%s3163_s3 + $0x130] sm:$0xff] }
  0x1a   :  { %853 = vmatpush.bf16.msra.mxu0 %v2296_v24  ;;  %v2341_v47 = vld [vmem:[%s3163_s3 + $0x170] sm:$0xff]  ;;  %v2332_v50 = vld [vmem:[%s3163_s3 + $0x128] sm:$0xff]  ;;  %v2331_v54 = vld [vmem:[%s3163_s3 + $0x120] sm:$0xff] }
  0x1b   :  { %866 = vmatpush.bf16.msra.mxu1 %v2304_v25  ;;  %v249_v42 = vpack.c.b16 %v237_v32, %v237_v32  ;;  %v250_v44 = vpack.c.b16 %v238_v36, %v238_v36  ;;  %v2349_v48 = vld [vmem:[%s3163_s3 + $0x1b0] sm:$0xff]  ;;  %v2340_v51 = vld [vmem:[%s3163_s3 + $0x168] sm:$0xff]  ;;  %v2339_v55 = vld [vmem:[%s3163_s3 + $0x160] sm:$0xff] }
  0x1c   :  { %879 = vmatpush.bf16.msra.mxu2 %v2312_v26  ;;  %v2357_v49 = vld [vmem:[%s3163_s3 + $0x1f0] sm:$0xff]  ;;  %v2348_v52 = vld [vmem:[%s3163_s3 + $0x1a8] sm:$0xff]  ;;  %v2347_v56 = vld [vmem:[%s3163_s3 + $0x1a0] sm:$0xff] }
  0x1d   :  { %892 = vmatpush.bf16.msra.mxu3 %v2320_v27  ;;  %v2356_v53 = vld [vmem:[%s3163_s3 + $0x1e8] sm:$0xff]  ;;  %v2355_v57 = vld [vmem:[%s3163_s3 + $0x1e0] sm:$0xff]  ;;  %v2330_v58 = vld [vmem:[%s3163_s3 + $0x118] sm:$0xff] }
  0x1e   :  { %854 = vmatpush.bf16.msra.mxu0 %v2295_v30  ;;  %v2338_v59 = vld [vmem:[%s3163_s3 + $0x158] sm:$0xff]  ;;  %v2329_v62 = vld [vmem:[%s3163_s3 + $0x110] sm:$0xff]  ;;  %v2328_v2 = vld [vmem:[%s3163_s3 + $0x108] sm:$0xff] }
  0x1f   :  { %867 = vmatpush.bf16.msra.mxu1 %v2303_v31  ;;  %v2346_v60 = vld [vmem:[%s3163_s3 + $0x198] sm:$0xff]  ;;  %v2337_v63 = vld [vmem:[%s3163_s3 + $0x150] sm:$0xff]  ;;  %v2336_v3 = vld [vmem:[%s3163_s3 + $0x148] sm:$0xff] }
  0x20   :  { %880 = vmatpush.bf16.msra.mxu2 %v2311_v34  ;;  %v2354_v61 = vld [vmem:[%s3163_s3 + $0x1d8] sm:$0xff]  ;;  %v2345_v0 = vld [vmem:[%s3163_s3 + $0x190] sm:$0xff]  ;;  %v2344_v4 = vld [vmem:[%s3163_s3 + $0x188] sm:$0xff] }
  0x21   :  { %893 = vmatpush.bf16.msra.mxu3 %v2319_v35  ;;  %855 = vmatmul.bf16.vlgmr.msra.gmra.mxu0 %v247_v43  ;;  %v2353_v1 = vld [vmem:[%s3163_s3 + $0x1d0] sm:$0xff]  ;;  %v2352_v5 = vld [vmem:[%s3163_s3 + $0x1c8] sm:$0xff]  ;;  %v33_v6 = vld [vmem:[%s3160_s0 + $0x18] sm:$0xff] }
  0x22   :  { %899 = vmatpush.bf16.msrb.mxu0 %v2334_v38  ;;  %868 = vmatmul.bf16.vlgmr.msra.gmra.mxu1 %v248_v45  ;;  %v32_v7 = vld [vmem:[%s3160_s0 + $0x10] sm:$0xff]  ;;  %v2327_v8 = vld [vmem:[%s3163_s3 + $0x100] sm:$0xff]  ;;  %v241_v10 = vunpack.c.l.b16 %v33_v6  ;;  %v242_v14 = vunpack.c.h.b16 %v33_v6  ;;  %v2366_v16 = vld [vmem:[%s3163_s3 + $0x238] sm:$0xff] }
  0x23   :  { %912 = vmatpush.bf16.msrb.mxu1 %v2342_v39  ;;  %881 = vmatmul.bf16.vlgmr.msra.gmra.mxu2 %v249_v42  ;;  %v2335_v9 = vld [vmem:[%s3163_s3 + $0x140] sm:$0xff]  ;;  %v239_v11 = vunpack.c.l.b16 %v32_v7  ;;  %v240_v15 = vunpack.c.h.b16 %v32_v7  ;;  %v2374_v17 = vld [vmem:[%s3163_s3 + $0x278] sm:$0xff]  ;;  %v2365_v24 = vld [vmem:[%s3163_s3 + $0x230] sm:$0xff] }
  0x24   :  { %925 = vmatpush.bf16.msrb.mxu2 %v2350_v40  ;;  %894 = vmatmul.bf16.vlgmr.msra.gmra.mxu3 %v250_v44  ;;  %v2343_v12 = vld [vmem:[%s3163_s3 + $0x180] sm:$0xff]  ;;  %v2382_v18 = vld [vmem:[%s3163_s3 + $0x2b8] sm:$0xff]  ;;  %v253_v20 = vpack.c.b16 %v241_v10, %v241_v10  ;;  %v254_v22 = vpack.c.b16 %v242_v14, %v242_v14  ;;  %v2373_v25 = vld [vmem:[%s3163_s3 + $0x270] sm:$0xff] }
  0x25   :  { %938 = vmatpush.bf16.msrb.mxu3 %v2358_v41  ;;  %v2351_v13 = vld [vmem:[%s3163_s3 + $0x1c0] sm:$0xff]  ;;  %v2390_v19 = vld [vmem:[%s3163_s3 + $0x2f8] sm:$0xff]  ;;  %v251_v21 = vpack.c.b16 %v239_v11, %v239_v11  ;;  %v252_v23 = vpack.c.b16 %v240_v15, %v240_v15  ;;  %v2381_v26 = vld [vmem:[%s3163_s3 + $0x2b0] sm:$0xff] }
  0x26   :  { %900 = vmatpush.bf16.msrb.mxu0 %v2333_v46  ;;  %v2389_v27 = vld [vmem:[%s3163_s3 + $0x2f0] sm:$0xff]  ;;  %v2364_v28 = vld [vmem:[%s3163_s3 + $0x228] sm:$0xff]  ;;  %v2363_v32 = vld [vmem:[%s3163_s3 + $0x220] sm:$0xff] }
  0x27   :  { %913 = vmatpush.bf16.msrb.mxu1 %v2341_v47  ;;  %v2372_v29 = vld [vmem:[%s3163_s3 + $0x268] sm:$0xff]  ;;  %v2371_v33 = vld [vmem:[%s3163_s3 + $0x260] sm:$0xff]  ;;  %v2362_v36 = vld [vmem:[%s3163_s3 + $0x218] sm:$0xff] }
  0x28   :  { %926 = vmatpush.bf16.msrb.mxu2 %v2349_v48  ;;  %v2380_v30 = vld [vmem:[%s3163_s3 + $0x2a8] sm:$0xff]  ;;  %v2379_v34 = vld [vmem:[%s3163_s3 + $0x2a0] sm:$0xff]  ;;  %v2370_v37 = vld [vmem:[%s3163_s3 + $0x258] sm:$0xff] }
  0x29   :  { %939 = vmatpush.bf16.msrb.mxu3 %v2357_v49  ;;  %v2388_v31 = vld [vmem:[%s3163_s3 + $0x2e8] sm:$0xff]  ;;  %v2387_v35 = vld [vmem:[%s3163_s3 + $0x2e0] sm:$0xff]  ;;  %v2378_v38 = vld [vmem:[%s3163_s3 + $0x298] sm:$0xff] }
  0x2a   :  { %901 = vmatpush.bf16.msrb.mxu0 %v2332_v50  ;;  %v2386_v39 = vld [vmem:[%s3163_s3 + $0x2d8] sm:$0xff]  ;;  %v2361_v40 = vld [vmem:[%s3163_s3 + $0x210] sm:$0xff]  ;;  %v2360_v44 = vld [vmem:[%s3163_s3 + $0x208] sm:$0xff] }
  0x2b   :  { %914 = vmatpush.bf16.msrb.mxu1 %v2340_v51  ;;  %v2369_v41 = vld [vmem:[%s3163_s3 + $0x250] sm:$0xff]  ;;  %v2368_v45 = vld [vmem:[%s3163_s3 + $0x248] sm:$0xff]  ;;  %v34_v46 = vld [vmem:[%s3160_s0 + $0x20] sm:$0xff] }
  0x2c   :  { %927 = vmatpush.bf16.msrb.mxu2 %v2348_v52  ;;  %v2377_v42 = vld [vmem:[%s3163_s3 + $0x290] sm:$0xff]  ;;  %v2376_v47 = vld [vmem:[%s3163_s3 + $0x288] sm:$0xff]  ;;  %v243_v50 = vunpack.c.l.b16 %v34_v46  ;;  %v244_v51 = vunpack.c.h.b16 %v34_v46  ;;  %v2359_v52 = vld [vmem:[%s3163_s3 + $0x200] sm:$0xff] }
  0x2d   :  { %940 = vmatpush.bf16.msrb.mxu3 %v2356_v53  ;;  %v2385_v43 = vld [vmem:[%s3163_s3 + $0x2d0] sm:$0xff]  ;;  %v2384_v48 = vld [vmem:[%s3163_s3 + $0x2c8] sm:$0xff]  ;;  %v2367_v53 = vld [vmem:[%s3163_s3 + $0x240] sm:$0xff] }
  0x2e   :  { %902 = vmatpush.bf16.msrb.mxu0 %v2331_v54  ;;  %v35_v49 = vld [vmem:[%s3160_s0 + $0x28] sm:$0xff]  ;;  %v29_v6 = vld [vmem:[%s3165_s5] sm:$0xff] }
  0x2f   :  { %915 = vmatpush.bf16.msrb.mxu1 %v2339_v55  ;;  %v245_v54 = vunpack.c.l.b16 %v35_v49  ;;  %v246_v55 = vunpack.c.h.b16 %v35_v49  ;;  %v228_v7 = vperm.slane %v29_v6, 0 }
  0x30   :  { %928 = vmatpush.bf16.msrb.mxu2 %v2347_v56  ;;  %v2375_v56 = vld [vmem:[%s3163_s3 + $0x280] sm:$0xff] }
  0x31   :  { %941 = vmatpush.bf16.msrb.mxu3 %v2355_v57  ;;  %v2383_v57 = vld [vmem:[%s3163_s3 + $0x2c0] sm:$0xff] }
  0x32   :  { %903 = vmatpush.bf16.msrb.mxu0 %v2330_v58  ;;  %v255_v58 = vpack.c.b16 %v243_v50, %v243_v50 }
  0x33   :  { %916 = vmatpush.bf16.msrb.mxu1 %v2338_v59  ;;  %v256_v59 = vpack.c.b16 %v244_v51, %v244_v51 }
  0x34   :  { %929 = vmatpush.bf16.msrb.mxu2 %v2346_v60  ;;  %v257_v60 = vpack.c.b16 %v245_v54, %v245_v54 }
  0x35   :  { %942 = vmatpush.bf16.msrb.mxu3 %v2354_v61  ;;  %v258_v61 = vpack.c.b16 %v246_v55, %v246_v55 }
  0x36   :  { %904 = vmatpush.bf16.msrb.mxu0 %v2329_v62 }
  0x37   :  { %917 = vmatpush.bf16.msrb.mxu1 %v2337_v63 }
  0x38   :  { %930 = vmatpush.bf16.msrb.mxu2 %v2345_v0 }
  0x39   :  { %943 = vmatpush.bf16.msrb.mxu3 %v2353_v1 }
  0x3a   :  { %905 = vmatpush.bf16.msrb.mxu0 %v2328_v2 }
  0x3b   :  { %918 = vmatpush.bf16.msrb.mxu1 %v2336_v3 }
  0x3c   :  { %931 = vmatpush.bf16.msrb.mxu2 %v2344_v4 }
  0x3d   :  { %944 = vmatpush.bf16.msrb.mxu3 %v2352_v5 }
  0x3e   :  { %906 = vmatpush.bf16.msrb.mxu0 %v2327_v8 }
  0x3f   :  { %919 = vmatpush.bf16.msrb.mxu1 %v2335_v9 }
  0x40   :  { %932 = vmatpush.bf16.msrb.mxu2 %v2343_v12 }
  0x41   :  { %945 = vmatpush.bf16.msrb.mxu3 %v2351_v13  ;;  %907 = vmatmul.bf16.vlgmr.msrb.gmra.mxu0 %v251_v21 }
  0x42   :  { %951 = vmatpush.bf16.msra.mxu0 %v2366_v16  ;;  %920 = vmatmul.bf16.vlgmr.msrb.gmra.mxu1 %v252_v23 }
  0x43   :  { %964 = vmatpush.bf16.msra.mxu1 %v2374_v17  ;;  %933 = vmatmul.bf16.vlgmr.msrb.gmra.mxu2 %v253_v20 }
  0x44   :  { %977 = vmatpush.bf16.msra.mxu2 %v2382_v18  ;;  %946 = vmatmul.bf16.vlgmr.msrb.gmra.mxu3 %v254_v22 }
  0x45   :  { %990 = vmatpush.bf16.msra.mxu3 %v2390_v19 }
  0x46   :  { %952 = vmatpush.bf16.msra.mxu0 %v2365_v24 }
  0x47   :  { %965 = vmatpush.bf16.msra.mxu1 %v2373_v25 }
  0x48   :  { %978 = vmatpush.bf16.msra.mxu2 %v2381_v26 }
  0x49   :  { %991 = vmatpush.bf16.msra.mxu3 %v2389_v27 }
  0x4a   :  { %953 = vmatpush.bf16.msra.mxu0 %v2364_v28 }
  0x4b   :  { %966 = vmatpush.bf16.msra.mxu1 %v2372_v29 }
  0x4c   :  { %979 = vmatpush.bf16.msra.mxu2 %v2380_v30 }
  0x4d   :  { %992 = vmatpush.bf16.msra.mxu3 %v2388_v31 }
  0x4e   :  { %954 = vmatpush.bf16.msra.mxu0 %v2363_v32 }
  0x4f   :  { %967 = vmatpush.bf16.msra.mxu1 %v2371_v33 }
  0x50   :  { %980 = vmatpush.bf16.msra.mxu2 %v2379_v34 }
  0x51   :  { %993 = vmatpush.bf16.msra.mxu3 %v2387_v35 }
  0x52   :  { %955 = vmatpush.bf16.msra.mxu0 %v2362_v36 }
  0x53   :  { %968 = vmatpush.bf16.msra.mxu1 %v2370_v37  ;;  %v2514_v37 = vmov 32.0  }
  0x54   :  { %981 = vmatpush.bf16.msra.mxu2 %v2378_v38  ;;  %2436 = vrcp.f32 %v2514_v37  ;;  %v2259_v38 = vld [vmem:[%s3164_s4 + $0x10] sm:$0xf] }
  0x55   :  { %994 = vmatpush.bf16.msra.mxu3 %v2386_v39  ;;  %v2294_v39 = vld [vmem:[%s3164_s4 + $0x14] sm:$0xf0] }
  0x56   :  { %956 = vmatpush.bf16.msra.mxu0 %v2361_v40  ;;  %v2255_v40 = vld [vmem:[%s3164_s4] sm:$0xf] }
  0x57   :  { %969 = vmatpush.bf16.msra.mxu1 %v2369_v41  ;;  %v2882_v41 = vor.u32 %v2294_v39, %v2259_v38 }
  0x58   :  { %982 = vmatpush.bf16.msra.mxu2 %v2377_v42  ;;  %v2292_v42 = vld [vmem:[%s3164_s4 + $0x4] sm:$0xf0] }
  0x59   :  { %995 = vmatpush.bf16.msra.mxu3 %v2385_v43  ;;  %v2887_v43 = vperm.slane %v29_v6, 1  ;;  %v2256_v46 = vor.u32 %v2292_v42, %v2255_v40  ;;  %v2940_v40 = vld [vmem:[%s3162_s2 + $0x10] sm:$0xff] }
  0x5a   :  { %957 = vmatpush.bf16.msra.mxu0 %v2360_v44  ;;  %v2515_v44 = vmov 0  }
  0x5b   :  { %970 = vmatpush.bf16.msra.mxu1 %v2368_v45  ;;  %2405 = vset.pattern.permute.xlu1 %v2515_v44  ;;  %v2437_v45 = vpop.eup %2436 }
  0x5c   :  { %983 = vmatpush.bf16.msra.mxu2 %v2376_v47  ;;  %2406 = vset.pattern.permute.xlu2 %v2515_v44  ;;  %v1008_v47 = vmul.f32 32.0, %v2437_v45  ;;  %vm1012_vm1 = vweird.f32 %v2437_v45 }
  0x5d   :  { %996 = vmatpush.bf16.msra.mxu3 %v2384_v48  ;;  %1113 = vrot.lane.b32.xlu1 %v2887_v43, %s2516_s16 }
  0x5e   :  { %958 = vmatpush.bf16.msra.mxu0 %v2359_v52  ;;  %v1009_v48 = vsub.f32 1.0, %v1008_v47 }
  0x5f   :  { %971 = vmatpush.bf16.msra.mxu1 %v2367_v53 }
  0x60   :  { %984 = vmatpush.bf16.msra.mxu2 %v2375_v56  ;;  %v1010_v49 = vmul.f32 %v2437_v45, %v1009_v48 }
  0x61   :  { %997 = vmatpush.bf16.msra.mxu3 %v2383_v57  ;;  %959 = vmatmul.bf16.vlgmr.msra.gmra.mxu0 %v255_v58  ;;  %v2293_v57 = vld [vmem:[%s3164_s4 + $0x14] sm:$0xf]  ;;  %v2248_v58 = vld [vmem:[%s3164_s4 + $0x18] sm:$0xf0] }
  0x62   :  { %972 = vmatmul.bf16.vlgmr.msra.gmra.mxu1 %v256_v59  ;;  %v1011_v50 = vadd.f32 %v2437_v45, %v1010_v49  ;;  %v2908_v59 = vor.u32 %v2293_v57, %v2248_v58 }
  0x63   :  { %985 = vmatmul.bf16.vlgmr.msra.gmra.mxu2 %v257_v60  ;;  %1085 = vmatpush.bf16.msrb.mxu1 %v2882_v41  ;;  %v2291_v60 = vld [vmem:[%s3164_s4 + $0x4] sm:$0xf] }
  0x64   :  { %998 = vmatmul.bf16.vlgmr.msra.gmra.mxu3 %v258_v61  ;;  %1166 = vmatpush.bf16.msrb.mxu2 %v2882_v41  ;;  %v1013_v51 = vsel %vm1012_vm1, %v2437_v45, %v1011_v50  ;;  %v2244_v61 = vld [vmem:[%s3164_s4 + $0x8] sm:$0xf0]  ;;  %s2518_s4 = smov 64  }
  0x65   :  { %1248 = vmatpush.bf16.msrb.mxu3 %v2882_v41  ;;  %1047 = vrot.lane.b32.xlu1 %v228_v7, %s2516_s16 }
  0x66   :  { %1059 = vmatpush.bf16.msrb.mxu0 %v2908_v59 }
  0x67   :  { %1086 = vmatpush.bf16.msrb.mxu1 %v2256_v46 }
  0x68   :  { %1167 = vmatpush.bf16.msrb.mxu2 %v2256_v46 }
  0x69   :  { %1249 = vmatpush.bf16.msrb.mxu3 %v2256_v46 }
  0x6b   :  { %1430 = vmatpush.bf16.msra.mxu1 %v2882_v41 }
  0x6c   :  { %1530 = vmatpush.bf16.msra.mxu2 %v2882_v41 }
  0x6d   :  { %1636 = vmatpush.bf16.msra.mxu3 %v2882_v41 }
  0x6f   :  { %1431 = vmatpush.bf16.msra.mxu1 %v2256_v46 }
  0x70   :  { %1531 = vmatpush.bf16.msra.mxu2 %v2256_v46 }
  0x71   :  { %1637 = vmatpush.bf16.msra.mxu3 %v2256_v46 }
  0x72   :  { %1087 = vmatmul.bf16.vlgmr.msrb.gmra.mxu1 %v2515_v44 }
  0x9e   :  { %v856_v62 = vpop.f32.mrf.mxu0 }
  0x9f   :  { %v869_v63 = vpop.f32.mrf.mxu1  ;;  %v857_v9 = vadd.f32 %v856_v62, %v228_v7  ;;  %v2917_v62 = vor.u32 %v2291_v60, %v2244_v61 }
  0xa1   :  { %v870_v11 = vadd.f32 %v869_v63, %v857_v9  ;;  %1060 = vmatpush.bf16.msrb.mxu0 %v2917_v62 }
  0xa5   :  { %1336 = vmatpush.bf16.msra.mxu0 %v2882_v41 }
  0xa6   :  { %v882_v0 = vpop.f32.mrf.mxu2  ;;  %v858_v2 = vpop.f32.mrf.mxu0 }
  0xa7   :  { %v895_v1 = vpop.f32.mrf.mxu3  ;;  %v871_v3 = vpop.f32.mrf.mxu1  ;;  %v883_v15 = vadd.f32 %v882_v0, %v870_v11 }
  0xa9   :  { %v896_v17 = vadd.f32 %v895_v1, %v883_v15  ;;  %1337 = vmatpush.bf16.msra.mxu0 %v2256_v46 }
  0xae   :  { %v884_v4 = vpop.f32.mrf.mxu2 }
  0xaf   :  { %v897_v5 = vpop.f32.mrf.mxu3 }
  0xbe   :  { %v908_v8 = vpop.f32.mrf.mxu0 }
  0xbf   :  { %v921_v10 = vpop.f32.mrf.mxu1  ;;  %v909_v20 = vadd.f32 %v908_v8, %v896_v17 }
  0xc1   :  { %v922_v21 = vadd.f32 %v921_v10, %v909_v20 }
  0xc6   :  { %v934_v12 = vpop.f32.mrf.mxu2  ;;  %v910_v14 = vpop.f32.mrf.mxu0 }
  0xc7   :  { %v947_v13 = vpop.f32.mrf.mxu3  ;;  %v923_v16 = vpop.f32.mrf.mxu1  ;;  %v935_v22 = vadd.f32 %v934_v12, %v922_v21 }
  0xc9   :  { %v948_v23 = vadd.f32 %v947_v13, %v935_v22 }
  0xce   :  { %v936_v18 = vpop.f32.mrf.mxu2 }
  0xcf   :  { %v949_v19 = vpop.f32.mrf.mxu3  ;;  %v2921_v0 = vpop.permute.xlu1 %1113 }
  0xd7   :  { %v1048_v15 = vpop.permute.xlu1 %1047 }
  0xde   :  { %v960_v24 = vpop.f32.mrf.mxu0 }
  0xdf   :  { %v973_v25 = vpop.f32.mrf.mxu1  ;;  %v961_v26 = vadd.f32 %v960_v24, %v948_v23 }
  0xe1   :  { %v974_v27 = vadd.f32 %v973_v25, %v961_v26 }
  0xe6   :  { %v986_v28 = vpop.f32.mrf.mxu2  ;;  %v962_v31 = vpop.f32.mrf.mxu0 }
  0xe7   :  { %v999_v29 = vpop.f32.mrf.mxu3  ;;  %v987_v30 = vadd.f32 %v986_v28, %v974_v27  ;;  %v975_v32 = vpop.f32.mrf.mxu1 }
  0xe9   :  { %v1000_v33 = vadd.f32 %v999_v29, %v987_v30 }
  0xeb   :  { %v1004_v34 = vsel %vm1003_vm0, %v1000_v33, 0.0 }
  0xec   :  { %1005 = vadd.xlane.f32.xlu0 %v1004_v34 }
  0xee   :  { %v988_v35 = vpop.f32.mrf.mxu2 }
  0xef   :  { %v1001_v36 = vpop.f32.mrf.mxu3  ;;  %v1088_v63 = vpop.f32.mrf.mxu1  ;;  %v2931_v35 = vld [vmem:[%s3162_s2 + $0x8] sm:$0xff] }
  0xf0   :  { %v1116_v1 = vadd.f32 %v2921_v0, %v1088_v63  ;;  %1149 = vperm.xlu1 %2405, %v2931_v35   ;;  %v2519_v36 = vmov 1  }
  0xf1   :  { %2407 = vset.pattern.permute.xlu0 %v2519_v36 }
  0xf2   :  { %1118 = vrot.lane.b32.xlu2 %v1116_v1, %s2517_s25 }
  0xf7   :  { %v1090_v5 = vpop.f32.mrf.mxu1 }
  0xf8   :  { %2409 = vset.pattern.permute.xlu1 %v2519_v36 }
 0x14c   :  { %v1119_v30 = vpop.permute.xlu2 %1118 }
 0x15f   :  { %v1006_v52 = vpop.xlane.xlu0 %1005 }
 0x160   :  { %v1014_v53 = vmul.f32 %v1013_v51, %v1006_v52 }
 0x162   :  { %v1015_v54 = vsub.f32 %v1000_v33, %v1014_v53  ;;  %v1150_v48 = vpop.permute.xlu1 %1149 }
 0x164   :  { %v1016_v55 = vmul.f32 %v1015_v54, %v1015_v54 }
 0x166   :  { %v1017_v56 = vsel %vm1003_vm0, %v1016_v55, 0.0 }
 0x167   :  { %1018 = vadd.xlane.f32.xlu0 %v1017_v56  ;;  %v2263_v56 = vld [vmem:[%s3161_s1 + $0x8] sm:$0xff] }
 0x1da   :  { %v1019_v2 = vpop.xlane.xlu0 %1018 }
 0x1db   :  { %v1020_v3 = vmul.f32 %v1019_v2, %v1013_v51 }
 0x1dd   :  { %v1021_v4 = vadd.f32 1e-06, %v1020_v3 }
 0x1df   :  { %2438 = vrsqrt.f32 %v1021_v4  ;;  %vm1028_vm3 = vweird.f32 %v1021_v4 }
 0x1e5   :  { %v2439_v6 = vpop.eup %2438 }
 0x1e6   :  { %v1023_v7 = vmul.f32 %v2439_v6, %v1021_v4  ;;  %vm1029_vm2 = vweird.f32 %v2439_v6 }
 0x1e7   :  { %vm1030_vm4 = vmor %vm1028_vm3, %vm1029_vm2 }
 0x1e8   :  { %v1024_v8 = vmul.f32 %v2439_v6, %v1023_v7 }
 0x1ea   :  { %v1025_v9 = vmul.f32 0.5, %v1024_v8 }
 0x1ec   :  { %v1026_v10 = vsub.f32 1.5, %v1025_v9 }
 0x1ee   :  { %v1027_v11 = vmul.f32 %v2439_v6, %v1026_v10 }
 0x1f0   :  { %v1031_v12 = vsel %vm1030_vm4, %v2439_v6, %v1027_v11 }
 0x1f1   :  { %v1032_v13 = vmul.f32 %v1031_v12, %v1015_v54 }
 0x1f3   :  { %v1033_v14 = vpack.c.bf16 %v1032_v13, %v1032_v13 }
 0x1f5   :  { %2252 = vmatmul.msk.bf16.vlgmr.msrb.gmra.mxu0 %vm1003_vm0, %v1033_v14 }
 0x1f6   :  { %1748 = vmatpush.bf16.msrb.mxu0 %v2882_v41  ;;  %v2946_v41 = vld [vmem:[%s3162_s2 + $0x18] sm:$0xff] }
 0x1fa   :  { %1749 = vmatpush.bf16.msrb.mxu0 %v2256_v46 }
 0x272   :  { %v1062_v16 = vpop.f32.mrf.mxu0 }
 0x273   :  { %v1063_v17 = vadd.f32 %v1062_v16, %v1048_v15 }
 0x275   :  { %v1092_v18 = vadd.f32 %v1088_v63, %v1063_v17 }
 0x277   :  { %v2261_v19 = vmul.f32 -1.442695, %v1092_v18 }
 0x279   :  { %2440 = vpow2.f32 %v2261_v19 }
 0x27a   :  { %v1064_v20 = vpop.f32.mrf.mxu0 }
 0x27f   :  { %v2441_v21 = vpop.eup %2440 }
 0x280   :  { %v1096_v22 = vadd.f32 1.0, %v2441_v21 }
 0x282   :  { %2442 = vrcp.f32 %v1096_v22  ;;  %v1108_v26 = vand.u32 2147483648, %v1096_v22  ;;  %v1106_v28 = vand.u32 2147483647, %v1096_v22  ;;  %vm1102_vm6 = vweird.f32 %v1096_v22 }
 0x284   :  { %v1109_v31 = vor.u32 1.1754944e-38, %v1108_v26  ;;  %vm1107_vm8 = vcmp.eq.f32.partialorder %v1106_v28, 8.507059e+37 }
 0x288   :  { %v2443_v23 = vpop.eup %2442 }
 0x289   :  { %v1098_v24 = vmul.f32 %v2443_v23, %v1096_v22  ;;  %vm1103_vm5 = vweird.f32 %v2443_v23 }
 0x28a   :  { %vm1104_vm7 = vmor %vm1102_vm6, %vm1103_vm5 }
 0x28b   :  { %v1099_v25 = vsub.f32 1.0, %v1098_v24 }
 0x28d   :  { %v1100_v27 = vmul.f32 %v2443_v23, %v1099_v25 }
 0x28f   :  { %v1101_v29 = vadd.f32 %v2443_v23, %v1100_v27 }
 0x291   :  { %v1105_v32 = vsel %vm1104_vm7, %v2443_v23, %v1101_v29 }
 0x292   :  { %v1110_v33 = vsel %vm1107_vm8, %v1109_v31, %v1105_v32 }
 0x293   :  { %v1121_v34 = vmul.f32 %v1119_v30, %v1110_v33  ;;  %v1128_v42 = vsub.f32 1.0, %v1110_v33  ;;  %v2267_v30 = vld [vmem:[%s3161_s1 + $0x10] sm:$0xff] }
 0x295   :  { %1123 = vrot.lane.b32.xlu2 %v1121_v34, %s2518_s4  ;;  %v1129_v46 = vmul.f32 0.0, %v1128_v42 }
 0x2ef   :  { %v1124_v37 = vpop.permute.xlu2 %1123 }
 0x2f0   :  { %v1126_v38 = vadd.f32 %v1124_v37, %v1092_v18 }
 0x2f2   :  { %2444 = vtanh.f32 %v1126_v38 }
 0x2f8   :  { %v2445_v39 = vpop.eup %2444 }
 0x2f9   :  { %1131 = vrot.lane.b32.xlu0 %v2445_v39, %s2516_s16 }
 0x301   :  { %1230 = vperm.xlu0 %2407, %v2940_v40  }
 0x309   :  { %2408 = vset.pattern.permute.xlu0 %v2515_v44 }
 0x30a   :  { %1307 = vperm.xlu0 %2408, %v2946_v41  }
 0x312   :  { %2412 = vset.pattern.permute.xlu0 %v2519_v36 }
 0x36b   :  { %v1132_v45 = vpop.permute.xlu0 %1131 }
 0x36c   :  { %v1134_v47 = vmul.f32 %v1132_v45, %v1110_v33 }
 0x36e   :  { %v2951_v49 = vadd.f32 %v1134_v47, %v1129_v46 }
 0x370   :  { %v1152_v50 = vmul.f32 %v1150_v48, %v2951_v49 }
 0x372   :  { %v1153_v51 = vpack.c.bf16 %v1152_v50, %v1152_v50 }
 0x373   :  { %v1231_v21 = vpop.permute.xlu0 %1230 }
 0x374   :  { %1155 = vrot.lane.b32.xlu2 %v1153_v51, %s2516_s16 }
 0x3ce   :  { %v1156_v52 = vpop.permute.xlu2 %1155 }
 0x3cf   :  { %2264 = vmatmul.msk.bf16.vlgmr.msrb.gmra.mxu2 %vm1003_vm0, %v1156_v52 }
 0x452   :  { %v1169_v53 = vpop.f32.mrf.mxu2 }
 0x453   :  { %v1193_v54 = vadd.f32 %v1169_v53, %v2921_v0  ;;  %v1173_v57 = vadd.f32 %v2263_v56, %v1169_v53 }
 0x455   :  { %1195 = vrot.lane.b32.xlu1 %v1193_v54, %s2517_s25  ;;  %v2265_v58 = vmul.f32 -1.442695, %v1173_v57  ;;  %v2520_v54 = vmov 2  }
 0x457   :  { %2446 = vpow2.f32 %v2265_v58 }
 0x45a   :  { %v1171_v55 = vpop.f32.mrf.mxu2 }
 0x45d   :  { %v2447_v60 = vpop.eup %2446 }
 0x45e   :  { %v1177_v61 = vadd.f32 1.0, %v2447_v60 }
 0x460   :  { %2448 = vrcp.f32 %v1177_v61  ;;  %v1189_v5 = vand.u32 2147483648, %v1177_v61  ;;  %vm1183_vm10 = vweird.f32 %v1177_v61  ;;  %v1187_v6 = vand.u32 2147483647, %v1177_v61 }
 0x462   :  { %v1190_v8 = vor.u32 1.1754944e-38, %v1189_v5  ;;  %vm1188_vm12 = vcmp.eq.f32.partialorder %v1187_v6, 8.507059e+37 }
 0x466   :  { %v2449_v63 = vpop.eup %2448 }
 0x467   :  { %v1179_v1 = vmul.f32 %v2449_v63, %v1177_v61  ;;  %vm1184_vm9 = vweird.f32 %v2449_v63 }
 0x468   :  { %vm1185_vm11 = vmor %vm1183_vm10, %vm1184_vm9 }
 0x469   :  { %v1180_v2 = vsub.f32 1.0, %v1179_v1  ;;  %v1308_v1 = vpop.permute.xlu0 %1307 }
 0x46b   :  { %v1181_v3 = vmul.f32 %v2449_v63, %v1180_v2 }
 0x46d   :  { %v1182_v4 = vadd.f32 %v2449_v63, %v1181_v3 }
 0x46f   :  { %v1186_v7 = vsel %vm1185_vm11, %v2449_v63, %v1182_v4  ;;  %v1310_v4 = vmul.f32 %v1308_v1, %v2951_v49 }
 0x470   :  { %v1191_v10 = vsel %vm1188_vm12, %v1190_v8, %v1186_v7 }
 0x471   :  { %v1205_v15 = vsub.f32 1.0, %v1191_v10 }
 0x473   :  { %v1206_v17 = vmul.f32 %v1205_v15, %v1152_v50  ;;  %v2994_v15 = vld [vmem:[%s3162_s2 + $0x20] sm:$0xff] }
 0x4c7   :  { %v1196_v9 = vpop.permute.xlu1 %1195 }
 0x4c8   :  { %v1198_v11 = vmul.f32 %v1196_v9, %v1191_v10 }
 0x4ca   :  { %1200 = vrot.lane.b32.xlu2 %v1198_v11, %s2518_s4 }
 0x4d2   :  { %1225 = vperm.xlu2 %2406, %v2940_v40  }
 0x4da   :  { %2410 = vset.pattern.permute.xlu2 %v2520_v54 }
 0x524   :  { %v1201_v12 = vpop.permute.xlu2 %1200 }
 0x525   :  { %v1203_v13 = vadd.f32 %v1201_v12, %v1173_v57 }
 0x527   :  { %2450 = vtanh.f32 %v1203_v13 }
 0x52c   :  { %v1226_v19 = vpop.permute.xlu2 %1225 }
 0x52d   :  { %v2451_v14 = vpop.eup %2450  ;;  %v1228_v22 = vmul.f32 %v1226_v19, %v2951_v49 }
 0x52e   :  { %1208 = vrot.lane.b32.xlu1 %v2451_v14, %s2516_s16 }
 0x5a0   :  { %v1209_v16 = vpop.permute.xlu1 %1208 }
 0x5a1   :  { %v1211_v18 = vmul.f32 %v1209_v16, %v1191_v10  ;;  %v2271_v16 = vld [vmem:[%s3161_s1 + $0x18] sm:$0xff] }
 0x5a3   :  { %v2964_v20 = vadd.f32 %v1211_v18, %v1206_v17 }
 0x5a5   :  { %v1233_v23 = vmul.f32 %v1231_v21, %v2964_v20 }
 0x5a7   :  { %v1234_v24 = vadd.f32 %v1233_v23, %v1228_v22 }
 0x5a9   :  { %v1235_v25 = vpack.c.bf16 %v1234_v24, %v1234_v24 }
 0x5ab   :  { %1237 = vrot.lane.b32.xlu1 %v1235_v25, %s2516_s16 }
 0x61d   :  { %v1238_v26 = vpop.permute.xlu1 %1237 }
 0x61e   :  { %2268 = vmatmul.msk.bf16.vlgmr.msrb.gmra.mxu3 %vm1003_vm0, %v1238_v26 }
 0x6a1   :  { %v1251_v27 = vpop.f32.mrf.mxu3 }
 0x6a2   :  { %v1275_v28 = vadd.f32 %v1251_v27, %v2921_v0  ;;  %v1255_v31 = vadd.f32 %v2267_v30, %v1251_v27 }
 0x6a4   :  { %1277 = vrot.lane.b32.xlu2 %v1275_v28, %s2517_s25  ;;  %v2269_v32 = vmul.f32 -1.442695, %v1255_v31 }
 0x6a6   :  { %2452 = vpow2.f32 %v2269_v32 }
 0x6a9   :  { %v1253_v29 = vpop.f32.mrf.mxu3 }
 0x6ac   :  { %v2453_v33 = vpop.eup %2452 }
 0x6ad   :  { %v1259_v34 = vadd.f32 1.0, %v2453_v33 }
 0x6af   :  { %2454 = vrcp.f32 %v1259_v34  ;;  %v1271_v46 = vand.u32 2147483648, %v1259_v34  ;;  %vm1265_vm14 = vweird.f32 %v1259_v34  ;;  %v1269_v47 = vand.u32 2147483647, %v1259_v34 }
 0x6b1   :  { %v1272_v50 = vor.u32 1.1754944e-38, %v1271_v46  ;;  %vm1270_vm1 = vcmp.eq.f32.partialorder %v1269_v47, 8.507059e+37 }
 0x6b5   :  { %v2455_v37 = vpop.eup %2454 }
 0x6b6   :  { %v1261_v38 = vmul.f32 %v2455_v37, %v1259_v34  ;;  %vm1266_vm13 = vweird.f32 %v2455_v37  ;;  %v2521_v34 = vmov 3  }
 0x6b7   :  { %vm1267_vm15 = vmor %vm1265_vm14, %vm1266_vm13 }
 0x6b8   :  { %v1262_v39 = vsub.f32 1.0, %v1261_v38 }
 0x6ba   :  { %v1263_v42 = vmul.f32 %v2455_v37, %v1262_v39 }
 0x6bc   :  { %v1264_v45 = vadd.f32 %v2455_v37, %v1263_v42 }
 0x6be   :  { %v1268_v48 = vsel %vm1267_vm15, %v2455_v37, %v1264_v45 }
 0x6bf   :  { %v1273_v52 = vsel %vm1270_vm1, %v1272_v50, %v1268_v48 }
 0x6c0   :  { %v1287_v60 = vsub.f32 1.0, %v1273_v52 }
 0x6c2   :  { %v1288_v3 = vmul.f32 %v1287_v60, %v1234_v24 }
 0x6fe   :  { %v1278_v51 = vpop.permute.xlu2 %1277 }
 0x6ff   :  { %v1280_v53 = vmul.f32 %v1278_v51, %v1273_v52 }
 0x701   :  { %1282 = vrot.lane.b32.xlu1 %v1280_v53, %s2518_s4 }
 0x709   :  { %1312 = vperm.xlu1 %2409, %v2946_v41  }
 0x711   :  { %2413 = vset.pattern.permute.xlu1 %v2520_v54 }
 0x773   :  { %v1283_v55 = vpop.permute.xlu1 %1282 }
 0x774   :  { %v1285_v56 = vadd.f32 %v1283_v55, %v1255_v31 }
 0x776   :  { %2456 = vtanh.f32 %v1285_v56 }
 0x77b   :  { %v1313_v61 = vpop.permute.xlu1 %1312 }
 0x77c   :  { %v2457_v57 = vpop.eup %2456  ;;  %v1315_v2 = vmul.f32 %v1313_v61, %v2964_v20 }
 0x77d   :  { %1290 = vrot.lane.b32.xlu2 %v2457_v57, %s2516_s16 }
 0x77e   :  { %v1316_v7 = vadd.f32 %v1315_v2, %v1310_v4  ;;  %v2278_v2 = vld [vmem:[%s3162_s2 + $0x28] sm:$0xff] }
 0x785   :  { %1318 = vperm.xlu2 %2410, %v2946_v41  }
 0x78d   :  { %2411 = vset.pattern.permute.xlu2 %v2515_v44 }
 0x7d7   :  { %v1291_v58 = vpop.permute.xlu2 %1290 }
 0x7d8   :  { %v1293_v63 = vmul.f32 %v1291_v58, %v1273_v52 }
 0x7da   :  { %v2984_v5 = vadd.f32 %v1293_v63, %v1288_v3 }
 0x7df   :  { %v1319_v6 = vpop.permute.xlu2 %1318 }
 0x7e0   :  { %v1321_v8 = vmul.f32 %v1319_v6, %v2984_v5 }
 0x7e2   :  { %v1322_v9 = vadd.f32 %v1321_v8, %v1316_v7  ;;  %v2275_v8 = vld [vmem:[%s3161_s1 + $0x20] sm:$0xff] }
 0x7e4   :  { %v1323_v10 = vpack.c.bf16 %v1322_v9, %v1322_v9 }
 0x7e6   :  { %1325 = vrot.lane.b32.xlu1 %v1323_v10, %s2516_s16 }
 0x858   :  { %v1326_v11 = vpop.permute.xlu1 %1325 }
 0x859   :  { %2272 = vmatmul.msk.bf16.vlgmr.msra.gmra.mxu0 %vm1003_vm0, %v1326_v11 }
 0x8d6   :  { %v1339_v12 = vpop.f32.mrf.mxu0 }
 0x8d7   :  { %v1363_v13 = vadd.f32 %v1339_v12, %v2921_v0  ;;  %v1343_v17 = vadd.f32 %v2271_v16, %v1339_v12 }
 0x8d9   :  { %1365 = vrot.lane.b32.xlu2 %v1363_v13, %s2517_s25  ;;  %v2273_v18 = vmul.f32 -1.442695, %v1343_v17 }
 0x8db   :  { %2458 = vpow2.f32 %v2273_v18 }
 0x8de   :  { %v1341_v14 = vpop.f32.mrf.mxu0 }
 0x8e1   :  { %1395 = vperm.xlu2 %2411, %v2994_v15   ;;  %v2459_v19 = vpop.eup %2458 }
 0x8e2   :  { %v1347_v21 = vadd.f32 1.0, %v2459_v19 }
 0x8e4   :  { %2460 = vrcp.f32 %v1347_v21  ;;  %v1359_v27 = vand.u32 2147483648, %v1347_v21  ;;  %vm1353_vm3 = vweird.f32 %v1347_v21  ;;  %v1357_v28 = vand.u32 2147483647, %v1347_v21 }
 0x8e6   :  { %v1360_v30 = vor.u32 1.1754944e-38, %v1359_v27  ;;  %vm1358_vm5 = vcmp.eq.f32.partialorder %v1357_v28, 8.507059e+37  ;;  %v2522_v27 = vmov 4  }
 0x8e9   :  { %2414 = vset.pattern.permute.xlu2 %v2521_v34 }
 0x8ea   :  { %v2461_v22 = vpop.eup %2460  ;;  %1412 = vperm.xlu2 %2414, %v2994_v15  }
 0x8eb   :  { %v1349_v23 = vmul.f32 %v2461_v22, %v1347_v21  ;;  %vm1354_vm2 = vweird.f32 %v2461_v22 }
 0x8ec   :  { %vm1355_vm4 = vmor %vm1353_vm3, %vm1354_vm2 }
 0x8ed   :  { %v1350_v24 = vsub.f32 1.0, %v1349_v23 }
 0x8ef   :  { %v1351_v25 = vmul.f32 %v2461_v22, %v1350_v24 }
 0x8f1   :  { %v1352_v26 = vadd.f32 %v2461_v22, %v1351_v25 }
 0x8f2   :  { %2416 = vset.pattern.permute.xlu2 %v2519_v36 }
 0x8f3   :  { %v1356_v29 = vsel %vm1355_vm4, %v2461_v22, %v1352_v26 }
 0x8f4   :  { %v1361_v32 = vsel %vm1358_vm5, %v1360_v30, %v1356_v29 }
 0x8f5   :  { %v1375_v46 = vsub.f32 1.0, %v1361_v32 }
 0x8f7   :  { %v1376_v51 = vmul.f32 %v1375_v46, %v1322_v9 }
 0x933   :  { %v1366_v31 = vpop.permute.xlu2 %1365 }
 0x934   :  { %v1368_v33 = vmul.f32 %v1366_v31, %v1361_v32  ;;  %v3037_v31 = vld [vmem:[%s3162_s2 + $0x30] sm:$0xff] }
 0x936   :  { %1370 = vrot.lane.b32.xlu0 %v1368_v33, %s2518_s4  ;;  %v3045_v33 = vld [vmem:[%s3162_s2 + $0x38] sm:$0xff] }
 0x93b   :  { %v1396_v42 = vpop.permute.xlu2 %1395 }
 0x93c   :  { %v1398_v52 = vmul.f32 %v1396_v42, %v2951_v49 }
 0x93e   :  { %1400 = vperm.xlu0 %2412, %v2994_v15  }
 0x944   :  { %v1413_v55 = vpop.permute.xlu2 %1412 }
 0x946   :  { %2419 = vset.pattern.permute.xlu0 %v2522_v27 }
 0x9a8   :  { %v1371_v37 = vpop.permute.xlu0 %1370 }
 0x9a9   :  { %v1373_v38 = vadd.f32 %v1371_v37, %v1343_v17  ;;  %v1067_v37 = vld [vmem:[%s3162_s2] sm:$0xff] }
 0x9ab   :  { %2462 = vtanh.f32 %v1373_v38  ;;  %v2524_v38 = vmov 8  }
 0x9b0   :  { %v1401_v47 = vpop.permute.xlu0 %1400 }
 0x9b1   :  { %v2463_v39 = vpop.eup %2462  ;;  %v1403_v50 = vmul.f32 %v1401_v47, %v2964_v20 }
 0x9b2   :  { %1378 = vrot.lane.b32.xlu1 %v2463_v39, %s2516_s16 }
 0x9b3   :  { %v1404_v57 = vadd.f32 %v1403_v50, %v1398_v52 }
 0x9ba   :  { %1406 = vperm.xlu1 %2413, %v2994_v15  }
 0x9c2   :  { %2415 = vset.pattern.permute.xlu1 %v2515_v44 }
 0xa24   :  { %v1379_v45 = vpop.permute.xlu1 %1378 }
 0xa25   :  { %v1381_v48 = vmul.f32 %v1379_v45, %v1361_v32  ;;  %v2523_v32 = vmov 5  }
 0xa27   :  { %v3010_v53 = vadd.f32 %v1381_v48, %v1376_v51 }
 0xa29   :  { %v1415_v60 = vmul.f32 %v1413_v55, %v3010_v53 }
 0xa2c   :  { %v1407_v56 = vpop.permute.xlu1 %1406 }
 0xa2d   :  { %v1409_v58 = vmul.f32 %v1407_v56, %v2984_v5 }
 0xa2f   :  { %v1410_v61 = vadd.f32 %v1409_v58, %v1404_v57 }
 0xa31   :  { %v3014_v63 = vadd.f32 %v1415_v60, %v1410_v61 }
 0xa33   :  { %v1417_v1 = vpack.c.bf16 %v3014_v63, %v3014_v63 }
 0xa35   :  { %1419 = vrot.lane.b32.xlu1 %v1417_v1, %s2516_s16 }
 0xa3d   :  { %1489 = vperm.xlu1 %2415, %v2278_v2  }
 0xa45   :  { %2417 = vset.pattern.permute.xlu1 %v2520_v54 }
 0xa46   :  { %1500 = vperm.xlu1 %2417, %v2278_v2  }
 0xaa7   :  { %v1420_v3 = vpop.permute.xlu1 %1419 }
 0xaa8   :  { %2276 = vmatmul.msk.bf16.vlgmr.msra.gmra.mxu1 %vm1003_vm0, %v1420_v3 }
 0xaaf   :  { %v1490_v39 = vpop.permute.xlu1 %1489 }
 0xab0   :  { %v1492_v46 = vmul.f32 %v1490_v39, %v2951_v49 }
 0xab8   :  { %v1501_v48 = vpop.permute.xlu1 %1500 }
 0xab9   :  { %v1503_v55 = vmul.f32 %v1501_v48, %v2984_v5 }
 0xb25   :  { %v1433_v4 = vpop.f32.mrf.mxu1 }
 0xb26   :  { %v1457_v6 = vadd.f32 %v1433_v4, %v2921_v0  ;;  %v1437_v9 = vadd.f32 %v2275_v8, %v1433_v4 }
 0xb28   :  { %1459 = vrot.lane.b32.xlu2 %v1457_v6, %s2517_s25  ;;  %v2277_v10 = vmul.f32 -1.442695, %v1437_v9 }
 0xb2a   :  { %2464 = vpow2.f32 %v2277_v10 }
 0xb2d   :  { %v1435_v7 = vpop.f32.mrf.mxu1 }
 0xb30   :  { %1494 = vperm.xlu2 %2416, %v2278_v2   ;;  %v2465_v11 = vpop.eup %2464 }
 0xb31   :  { %v1441_v12 = vadd.f32 1.0, %v2465_v11 }
 0xb33   :  { %2466 = vrcp.f32 %v1441_v12  ;;  %v1453_v19 = vand.u32 2147483648, %v1441_v12  ;;  %vm1447_vm7 = vweird.f32 %v1441_v12  ;;  %v1451_v21 = vand.u32 2147483647, %v1441_v12 }
 0xb35   :  { %v1454_v23 = vor.u32 1.1754944e-38, %v1453_v19  ;;  %vm1452_vm9 = vcmp.eq.f32.partialorder %v1451_v21, 8.507059e+37 }
 0xb38   :  { %2418 = vset.pattern.permute.xlu2 %v2521_v34 }
 0xb39   :  { %1506 = vperm.xlu2 %2418, %v2278_v2   ;;  %v2467_v13 = vpop.eup %2466 }
 0xb3a   :  { %v1443_v14 = vmul.f32 %v2467_v13, %v1441_v12  ;;  %vm1448_vm6 = vweird.f32 %v2467_v13 }
 0xb3b   :  { %vm1449_vm8 = vmor %vm1447_vm7, %vm1448_vm6 }
 0xb3c   :  { %v1444_v16 = vsub.f32 1.0, %v1443_v14 }
 0xb3e   :  { %v1445_v17 = vmul.f32 %v2467_v13, %v1444_v16 }
 0xb40   :  { %v1446_v18 = vadd.f32 %v2467_v13, %v1445_v17 }
 0xb41   :  { %2420 = vset.pattern.permute.xlu2 %v2515_v44 }
 0xb42   :  { %v1450_v22 = vsel %vm1449_vm8, %v2467_v13, %v1446_v18 }
 0xb43   :  { %v1455_v25 = vsel %vm1452_vm9, %v1454_v23, %v1450_v22 }
 0xb44   :  { %v1469_v47 = vsub.f32 1.0, %v1455_v25 }
 0xb46   :  { %v1470_v57 = vmul.f32 %v1469_v47, %v3014_v63 }
 0xb82   :  { %v1460_v24 = vpop.permute.xlu2 %1459 }
 0xb83   :  { %v1462_v26 = vmul.f32 %v1460_v24, %v1455_v25 }
 0xb85   :  { %1464 = vrot.lane.b32.xlu0 %v1462_v26, %s2518_s4 }
 0xb8a   :  { %v1495_v42 = vpop.permute.xlu2 %1494 }
 0xb93   :  { %v1507_v50 = vpop.permute.xlu2 %1506 }
 0xb94   :  { %v1509_v56 = vmul.f32 %v1507_v50, %v3010_v53 }
 0xbf7   :  { %v1465_v28 = vpop.permute.xlu0 %1464 }
 0xbf8   :  { %v1467_v29 = vadd.f32 %v1465_v28, %v1437_v9  ;;  %v2279_v9 = vld [vmem:[%s3161_s1 + $0x28] sm:$0xff] }
 0xbfa   :  { %2468 = vtanh.f32 %v1467_v29 }
 0xc00   :  { %v2469_v30 = vpop.eup %2468 }
 0xc01   :  { %1472 = vrot.lane.b32.xlu0 %v2469_v30, %s2516_s16 }
 0xc09   :  { %1512 = vperm.xlu0 %2419, %v2278_v2  }
 0xc11   :  { %2421 = vset.pattern.permute.xlu0 %v2519_v36 }
 0xc12   :  { %1594 = vperm.xlu0 %2421, %v3037_v31  }
 0xc1a   :  { %2424 = vset.pattern.permute.xlu0 %v2523_v32 }
 0xc1b   :  { %1618 = vperm.xlu0 %2424, %v3037_v31  }
 0xc23   :  { %2426 = vset.pattern.permute.xlu0 %v2519_v36  ;;  %v1497_v36 = vmul.f32 %v1495_v42, %v2964_v20 }
 0xc24   :  { %1700 = vperm.xlu0 %2426, %v3045_v33  }
 0xc25   :  { %v1498_v51 = vadd.f32 %v1497_v36, %v1492_v46 }
 0xc27   :  { %v1504_v58 = vadd.f32 %v1503_v55, %v1498_v51 }
 0xc29   :  { %v1510_v1 = vadd.f32 %v1509_v56, %v1504_v58 }
 0xc2c   :  { %2430 = vset.pattern.permute.xlu0 %v2523_v32 }
 0xc2d   :  { %1724 = vperm.xlu0 %2430, %v3045_v33  }
 0xc35   :  { %2432 = vset.pattern.permute.xlu0 %v2524_v38 }
 0xc36   :  { %1138 = vperm.xlu0 %2432, %v1067_v37  }
 0xc3e   :  { %1578 = vperm.xlu0 %2432, %v2278_v2  }
 0xc46   :  { %1796 = vperm.xlu0 %2432, %v3045_v33  }
 0xc73   :  { %v1473_v45 = vpop.permute.xlu0 %1472 }
 0xc74   :  { %v1475_v52 = vmul.f32 %v1473_v45, %v1455_v25 }
 0xc76   :  { %v3060_v60 = vadd.f32 %v1475_v52, %v1470_v57 }
 0xc7b   :  { %v1513_v61 = vpop.permute.xlu0 %1512 }
 0xc7c   :  { %v1515_v2 = vmul.f32 %v1513_v61, %v3060_v60 }
 0xc7e   :  { %v1516_v3 = vadd.f32 %v1515_v2, %v1510_v1 }
 0xc80   :  { %v1517_v4 = vpack.c.bf16 %v1516_v3, %v1516_v3 }
 0xc82   :  { %1519 = vrot.lane.b32.xlu1 %v1517_v4, %s2516_s16 }
 0xc84   :  { %v1595_v42 = vpop.permute.xlu0 %1594 }
 0xc8d   :  { %v1619_v1 = vpop.permute.xlu0 %1618 }
 0xcf4   :  { %v1520_v6 = vpop.permute.xlu1 %1519 }
 0xcf5   :  { %2280 = vmatmul.msk.bf16.vlgmr.msra.gmra.mxu2 %vm1003_vm0, %v1520_v6 }
 0xd78   :  { %v1533_v7 = vpop.f32.mrf.mxu2 }
 0xd79   :  { %v1557_v8 = vadd.f32 %v1533_v7, %v2921_v0  ;;  %v1537_v10 = vadd.f32 %v2279_v9, %v1533_v7 }
 0xd7b   :  { %1559 = vrot.lane.b32.xlu2 %v1557_v8, %s2517_s25  ;;  %v2281_v11 = vmul.f32 -1.442695, %v1537_v10 }
 0xd7d   :  { %2470 = vpow2.f32 %v2281_v11 }
 0xd80   :  { %v1535_v63 = vpop.f32.mrf.mxu2 }
 0xd83   :  { %1589 = vperm.xlu2 %2420, %v3037_v31   ;;  %v2471_v12 = vpop.eup %2470 }
 0xd84   :  { %v1541_v13 = vadd.f32 1.0, %v2471_v12 }
 0xd86   :  { %2472 = vrcp.f32 %v1541_v13  ;;  %v1553_v21 = vand.u32 2147483648, %v1541_v13  ;;  %vm1547_vm11 = vweird.f32 %v1541_v13  ;;  %v1551_v22 = vand.u32 2147483647, %v1541_v13 }
 0xd88   :  { %v1554_v24 = vor.u32 1.1754944e-38, %v1553_v21  ;;  %vm1552_vm13 = vcmp.eq.f32.partialorder %v1551_v22, 8.507059e+37 }
 0xd8b   :  { %2423 = vset.pattern.permute.xlu2 %v2522_v27 }
 0xd8c   :  { %v2473_v14 = vpop.eup %2472 }
 0xd8d   :  { %v1543_v16 = vmul.f32 %v2473_v14, %v1541_v13  ;;  %vm1548_vm10 = vweird.f32 %v2473_v14 }
 0xd8e   :  { %vm1549_vm12 = vmor %vm1547_vm11, %vm1548_vm10 }
 0xd8f   :  { %v1544_v17 = vsub.f32 1.0, %v1543_v16 }
 0xd91   :  { %v1545_v18 = vmul.f32 %v2473_v14, %v1544_v17 }
 0xd93   :  { %v1546_v19 = vadd.f32 %v2473_v14, %v1545_v18 }
 0xd95   :  { %v1550_v23 = vsel %vm1549_vm12, %v2473_v14, %v1546_v19 }
 0xd96   :  { %v1555_v26 = vsel %vm1552_vm13, %v1554_v24, %v1550_v23 }
 0xd97   :  { %v1569_v45 = vsub.f32 1.0, %v1555_v26 }
 0xd99   :  { %v1570_v55 = vmul.f32 %v1569_v45, %v1516_v3 }
 0xdd5   :  { %v1560_v25 = vpop.permute.xlu2 %1559 }
 0xdd6   :  { %v1562_v28 = vmul.f32 %v1560_v25, %v1555_v26 }
 0xdd8   :  { %1564 = vrot.lane.b32.xlu1 %v1562_v28, %s2518_s4  ;;  %v2525_v28 = vmov 6  }
 0xddd   :  { %v1590_v37 = vpop.permute.xlu2 %1589 }
 0xdde   :  { %v1592_v46 = vmul.f32 %v1590_v37, %v2951_v49 }
 0xde0   :  { %1600 = vperm.xlu1 %2417, %v3037_v31  }
 0xde8   :  { %2422 = vset.pattern.permute.xlu1 %v2521_v34 }
 0xde9   :  { %1606 = vperm.xlu1 %2422, %v3037_v31  }
 0xdf1   :  { %2427 = vset.pattern.permute.xlu1 %v2520_v54  ;;  %v1597_v54 = vmul.f32 %v1595_v42, %v2964_v20 }
 0xdf3   :  { %v1598_v51 = vadd.f32 %v1597_v54, %v1592_v46 }
 0xe4a   :  { %v1565_v29 = vpop.permute.xlu1 %1564 }
 0xe4b   :  { %v1567_v30 = vadd.f32 %v1565_v29, %v1537_v10  ;;  %v2283_v10 = vld [vmem:[%s3161_s1 + $0x30] sm:$0xff] }
 0xe4d   :  { %2474 = vtanh.f32 %v1567_v30 }
 0xe52   :  { %v1601_v39 = vpop.permute.xlu1 %1600 }
 0xe53   :  { %v2475_v32 = vpop.eup %2474  ;;  %v1603_v48 = vmul.f32 %v1601_v39, %v2984_v5  ;;  %v1701_v39 = vpop.permute.xlu0 %1700 }
 0xe54   :  { %1572 = vrot.lane.b32.xlu2 %v2475_v32, %s2516_s16  ;;  %v1703_v46 = vmul.f32 %v1701_v39, %v2964_v20 }
 0xe55   :  { %v1604_v56 = vadd.f32 %v1603_v48, %v1598_v51 }
 0xe5b   :  { %v1607_v47 = vpop.permute.xlu1 %1606 }
 0xe5c   :  { %1612 = vperm.xlu2 %2423, %v3037_v31   ;;  %v1609_v52 = vmul.f32 %v1607_v47, %v3010_v53 }
 0xe5e   :  { %v1610_v58 = vadd.f32 %v1609_v52, %v1604_v56 }
 0xe64   :  { %2425 = vset.pattern.permute.xlu2 %v2515_v44 }
 0xeae   :  { %v1573_v36 = vpop.permute.xlu2 %1572 }
 0xeaf   :  { %v1575_v50 = vmul.f32 %v1573_v36, %v1555_v26 }
 0xeb1   :  { %v3084_v57 = vadd.f32 %v1575_v50, %v1570_v55 }
 0xeb3   :  { %v1621_v4 = vmul.f32 %v1619_v1, %v3084_v57 }
 0xeb6   :  { %v1613_v44 = vpop.permute.xlu2 %1612 }
 0xeb7   :  { %v1615_v61 = vmul.f32 %v1613_v44, %v3060_v60 }
 0xeb9   :  { %v1616_v2 = vadd.f32 %v1615_v61, %v1610_v58  ;;  %v1725_v61 = vpop.permute.xlu0 %1724 }
 0xebb   :  { %v3088_v6 = vadd.f32 %v1621_v4, %v1616_v2  ;;  %v1727_v2 = vmul.f32 %v1725_v61, %v3084_v57 }
 0xebd   :  { %v1623_v7 = vpack.c.bf16 %v3088_v6, %v3088_v6 }
 0xebf   :  { %1625 = vrot.lane.b32.xlu1 %v1623_v7, %s2516_s16 }
 0xf31   :  { %v1626_v8 = vpop.permute.xlu1 %1625 }
 0xf32   :  { %2284 = vmatmul.msk.bf16.vlgmr.msra.gmra.mxu3 %vm1003_vm0, %v1626_v8 }
 0xfb5   :  { %v1639_v3 = vpop.f32.mrf.mxu3 }
 0xfb6   :  { %v1663_v63 = vadd.f32 %v1639_v3, %v2921_v0  ;;  %v1643_v11 = vadd.f32 %v2283_v10, %v1639_v3 }
 0xfb8   :  { %1665 = vrot.lane.b32.xlu2 %v1663_v63, %s2517_s25  ;;  %v2285_v12 = vmul.f32 -1.442695, %v1643_v11 }
 0xfba   :  { %2476 = vpow2.f32 %v2285_v12  ;;  %v2287_v12 = vld [vmem:[%s3161_s1 + $0x38] sm:$0xff]  ;;  %s2527_s1 = smov [#allocation2]  }
 0xfbd   :  { %v1641_v9 = vpop.f32.mrf.mxu3 }
 0xfc0   :  { %1695 = vperm.xlu2 %2425, %v3045_v33   ;;  %v2477_v13 = vpop.eup %2476 }
 0xfc1   :  { %v1647_v14 = vadd.f32 1.0, %v2477_v13 }
 0xfc3   :  { %2478 = vrcp.f32 %v1647_v14  ;;  %vm1653_vm15 = vweird.f32 %v1647_v14  ;;  %v1657_v21 = vand.u32 2147483647, %v1647_v14 }
 0xfc5   :  { %vm1658_vm2 = vcmp.eq.f32.partialorder %v1657_v21, 8.507059e+37 }
 0xfc8   :  { %2428 = vset.pattern.permute.xlu2 %v2521_v34 }
 0xfc9   :  { %1712 = vperm.xlu2 %2428, %v3045_v33   ;;  %v2479_v16 = vpop.eup %2478 }
 0xfca   :  { %v1649_v34 = vmul.f32 %v2479_v16, %v1647_v14  ;;  %vm1654_vm14 = vweird.f32 %v2479_v16 }
 0xfcb   :  { %vm1655_vm1 = vmor %vm1653_vm15, %vm1654_vm14 }
 0xfcc   :  { %v1650_v17 = vsub.f32 1.0, %v1649_v34 }
 0xfce   :  { %v1651_v18 = vmul.f32 %v2479_v16, %v1650_v17 }
 0xfd0   :  { %v1652_v19 = vadd.f32 %v2479_v16, %v1651_v18 }
 0xfd1   :  { %2429 = vset.pattern.permute.xlu2 %v2522_v27  ;;  %v1659_v27 = vand.u32 2147483648, %v1647_v14 }
 0xfd2   :  { %1718 = vperm.xlu2 %2429, %v3045_v33   ;;  %v1656_v22 = vsel %vm1655_vm1, %v2479_v16, %v1652_v19 }
 0xfd3   :  { %v1660_v23 = vor.u32 1.1754944e-38, %v1659_v27 }
 0xfd5   :  { %v1661_v25 = vsel %vm1658_vm2, %v1660_v23, %v1656_v22 }
 0xfd6   :  { %v1675_v55 = vsub.f32 1.0, %v1661_v25 }
 0xfd8   :  { %v1676_v44 = vmul.f32 %v1675_v55, %v3088_v6 }
 0xfda   :  { %2434 = vset.pattern.permute.xlu2 %v2524_v38 }
0x1012   :  { %v1666_v24 = vpop.permute.xlu2 %1665 }
0x1013   :  { %v1668_v26 = vmul.f32 %v1666_v24, %v1661_v25 }
0x1015   :  { %1670 = vrot.lane.b32.xlu1 %v1668_v26, %s2518_s4 }
0x101a   :  { %v1696_v37 = vpop.permute.xlu2 %1695 }
0x101b   :  { %v1698_v45 = vmul.f32 %v1696_v37, %v2951_v49 }
0x101d   :  { %1706 = vperm.xlu1 %2427, %v3045_v33   ;;  %v1704_v54 = vadd.f32 %v1703_v46, %v1698_v45 }
0x1023   :  { %v1713_v42 = vpop.permute.xlu2 %1712 }
0x1024   :  { %v1715_v50 = vmul.f32 %v1713_v42, %v3010_v53 }
0x1025   :  { %2431 = vset.pattern.permute.xlu1 %v2525_v28 }
0x102c   :  { %v1719_v51 = vpop.permute.xlu2 %1718 }
0x1087   :  { %v1671_v29 = vpop.permute.xlu1 %1670 }
0x1088   :  { %v1673_v30 = vadd.f32 %v1671_v29, %v1643_v11 }
0x108a   :  { %2480 = vtanh.f32 %v1673_v30 }
0x108f   :  { %v1707_v36 = vpop.permute.xlu1 %1706 }
0x1090   :  { %v2481_v32 = vpop.eup %2480  ;;  %v1709_v47 = vmul.f32 %v1707_v36, %v2984_v5 }
0x1091   :  { %1678 = vrot.lane.b32.xlu1 %v2481_v32, %s2516_s16 }
0x1092   :  { %v1710_v48 = vadd.f32 %v1709_v47, %v1704_v54 }
0x1099   :  { %1730 = vperm.xlu1 %2431, %v3045_v33   ;;  %v1716_v33 = vadd.f32 %v1715_v50, %v1710_v48 }
0x10a1   :  { %2433 = vset.pattern.permute.xlu1 %v2524_v38  ;;  %v1721_v38 = vmul.f32 %v1719_v51, %v3060_v60 }
0x10a3   :  { %v1722_v58 = vadd.f32 %v1721_v38, %v1716_v33 }
0x10a5   :  { %v1728_v7 = vadd.f32 %v1727_v2, %v1722_v58 }
0x1103   :  { %v1679_v52 = vpop.permute.xlu1 %1678 }
0x1104   :  { %v1681_v56 = vmul.f32 %v1679_v52, %v1661_v25 }
0x1106   :  { %v3116_v1 = vadd.f32 %v1681_v56, %v1676_v44 }
0x110b   :  { %v1731_v4 = vpop.permute.xlu1 %1730 }
0x110c   :  { %v1733_v8 = vmul.f32 %v1731_v4, %v3116_v1 }
0x110e   :  { %v3120_v3 = vadd.f32 %v1733_v8, %v1728_v7 }
0x1110   :  { %v1735_v63 = vpack.c.bf16 %v3120_v3, %v3120_v3 }
0x1112   :  { %1737 = vrot.lane.b32.xlu2 %v1735_v63, %s2516_s16 }
0x116c   :  { %v1738_v9 = vpop.permute.xlu2 %1737 }
0x116d   :  { %2288 = vmatmul.msk.bf16.vlgmr.msrb.gmra.mxu0 %vm1003_vm0, %v1738_v9 }
0x11ea   :  { %v1751_v6 = vpop.f32.mrf.mxu0 }
0x11eb   :  { %v1775_v10 = vadd.f32 %v1751_v6, %v2921_v0  ;;  %v1755_v13 = vadd.f32 %v2287_v12, %v1751_v6 }
0x11ed   :  { %1777 = vrot.lane.b32.xlu1 %v1775_v10, %s2517_s25  ;;  %v2289_v14 = vmul.f32 -1.442695, %v1755_v13  ;;  %v2526_v10 = vmov 96  }
0x11ee   :  { %2435 = vset.pattern.permute.xlu0 %v2526_v10 }
0x11ef   :  { %2482 = vpow2.f32 %v2289_v14 }
0x11f2   :  { %v1753_v11 = vpop.f32.mrf.mxu0 }
0x11f5   :  { %1214 = vperm.xlu1 %2433, %v2931_v35   ;;  %v2483_v16 = vpop.eup %2482 }
0x11f6   :  { %v1759_v34 = vadd.f32 1.0, %v2483_v16 }
0x11f8   :  { %2484 = vrcp.f32 %v1759_v34  ;;  %v1771_v22 = vand.u32 2147483648, %v1759_v34  ;;  %vm1765_vm4 = vweird.f32 %v1759_v34  ;;  %v1769_v35 = vand.u32 2147483647, %v1759_v34 }
0x11fa   :  { %v1772_v23 = vor.u32 1.1754944e-38, %v1771_v22  ;;  %vm1770_vm6 = vcmp.eq.f32.partialorder %v1769_v35, 8.507059e+37 }
0x11fd   :  { %1384 = vperm.xlu1 %2433, %v2946_v41  }
0x11fe   :  { %v2485_v17 = vpop.eup %2484 }
0x11ff   :  { %v1761_v18 = vmul.f32 %v2485_v17, %v1759_v34  ;;  %vm1766_vm3 = vweird.f32 %v2485_v17 }
0x1200   :  { %vm1767_vm5 = vmor %vm1765_vm4, %vm1766_vm3 }
0x1201   :  { %v1762_v19 = vsub.f32 1.0, %v1761_v18 }
0x1203   :  { %v1763_v27 = vmul.f32 %v2485_v17, %v1762_v19 }
0x1205   :  { %v1764_v21 = vadd.f32 %v2485_v17, %v1763_v27 }
0x1207   :  { %v1768_v41 = vsel %vm1767_vm5, %v2485_v17, %v1764_v21 }
0x1208   :  { %v1773_v25 = vsel %vm1770_vm6, %v1772_v23, %v1768_v41 }
0x1209   :  { %v1787_v54 = vsub.f32 1.0, %v1773_v25 }
0x125f   :  { %v1778_v24 = vpop.permute.xlu1 %1777 }
0x1260   :  { %v1780_v26 = vmul.f32 %v1778_v24, %v1773_v25 }
0x1262   :  { %1782 = vrot.lane.b32.xlu2 %v1780_v26, %s2518_s4 }
0x1267   :  { %v1215_v32 = vpop.permute.xlu1 %1214 }
0x126a   :  { %1296 = vperm.xlu2 %2434, %v2940_v40  }
0x126f   :  { %v1385_v36 = vpop.permute.xlu1 %1384 }
0x1270   :  { %v1387_v46 = vmul.f32 %v1385_v36, %v3010_v53 }
0x1272   :  { %1478 = vperm.xlu2 %2434, %v2994_v15   ;;  %v1139_v15 = vpop.permute.xlu0 %1138 }
0x127a   :  { %1684 = vperm.xlu2 %2434, %v3037_v31   ;;  %v1217_v31 = vmul.f32 %v1215_v32, %v2964_v20  ;;  %v1579_v47 = vpop.permute.xlu0 %1578 }
0x127b   :  { %v1581_v20 = vmul.f32 %v1579_v47, %v3084_v57 }
0x1282   :  { %1805 = vrot.lane.b32.xlu2 %v2917_v62, %s2517_s25  ;;  %v1141_v62 = vmul.f32 %v1139_v15, %v2951_v49  ;;  %v1788_v49 = vmul.f32 %v1787_v54, %v3120_v3  ;;  %v1797_v56 = vpop.permute.xlu0 %1796 }
0x1284   :  { %v1218_v42 = vadd.f32 %v1217_v31, %v1141_v62 }
0x12bc   :  { %v1783_v28 = vpop.permute.xlu2 %1782 }
0x12bd   :  { %v1785_v29 = vadd.f32 %v1783_v28, %v1755_v13 }
0x12bf   :  { %2486 = vtanh.f32 %v1785_v29 }
0x12c4   :  { %v1297_v40 = vpop.permute.xlu2 %1296 }
0x12c5   :  { %v2487_v30 = vpop.eup %2486  ;;  %v1299_v39 = vmul.f32 %v1297_v40, %v2984_v5 }
0x12c6   :  { %1790 = vrot.lane.b32.xlu1 %v2487_v30, %s2516_s16 }
0x12c7   :  { %v1300_v45 = vadd.f32 %v1299_v39, %v1218_v42 }
0x12c9   :  { %v1388_v48 = vadd.f32 %v1387_v46, %v1300_v45 }
0x12cc   :  { %v1479_v37 = vpop.permute.xlu2 %1478 }
0x12ce   :  { %1807 = vrot.lane.b32.xlu1 %v2908_v59, %s2517_s25  ;;  %v1481_v59 = vmul.f32 %v1479_v37, %v3060_v60 }
0x12d0   :  { %v1482_v51 = vadd.f32 %v1481_v59, %v1388_v48 }
0x12d2   :  { %v1582_v33 = vadd.f32 %v1581_v20, %v1482_v51 }
0x12d4   :  { %v1685_v50 = vpop.permute.xlu2 %1684 }
0x12d5   :  { %v1687_v55 = vmul.f32 %v1685_v50, %v3116_v1 }
0x12d6   :  { %1830 = vrot.lane.b32.xlu1 %v2887_v43, %s2518_s4 }
0x12d7   :  { %v1688_v44 = vadd.f32 %v1687_v55, %v1582_v33 }
0x12dc   :  { %v1806_v2 = vpop.permute.xlu2 %1805 }
0x1338   :  { %v1791_v52 = vpop.permute.xlu1 %1790 }
0x1339   :  { %v1793_v5 = vmul.f32 %v1791_v52, %v1773_v25 }
0x133b   :  { %v1794_v38 = vadd.f32 %v1793_v5, %v1788_v49 }
0x133d   :  { %v1799_v53 = vmul.f32 %v1797_v56, %v1794_v38 }
0x133f   :  { %v1800_v58 = vadd.f32 %v1799_v53, %v1688_v44 }
0x1340   :  { %v1808_v60 = vpop.permute.xlu1 %1807 }
0x1341   :  { %v1801_v61 = vpack.c.bf16 %v1800_v58, %v1800_v58  ;;  %1820 = vmatpush.bf16.msrb.mxu1 %v1808_v60 }
0x1343   :  { %1803 = vrot.lane.b32.xlu0 %v1801_v61, %s2516_s16  ;;  %s1849_s16 = sshll.u32 %s2527_s1, 4  ;;  %s1850_s16 = int_to_ptr.vmem [resolvable:$true] %s1849_s16 }
0x1345   :  { %1821 = vmatpush.bf16.msrb.mxu1 %v1806_v2 }
0x1348   :  { %v1831_v8 = vpop.permute.xlu1 %1830 }
0x13b5   :  { %v1804_v4 = vpop.permute.xlu0 %1803 }
0x13b6   :  { %2290 = vmatmul.msk.bf16.vlgmr.msrb.gmra.mxu1 %vm1003_vm0, %v1804_v4 }
0x1433   :  { %v1823_v57 = vpop.f32.mrf.mxu1 }
0x1434   :  { %v1824_v1 = vadd.f32 %v1823_v57, %v2921_v0 }
0x1436   :  { %v1828_v7 = vmul.f32 0.01, %v1824_v1  ;;  %vm1827_vm7 = vcmp.ge.f32.partialorder %v1824_v1, 0.0 }
0x1438   :  { %v1829_v3 = vsel %vm1827_vm7, %v1824_v1, %v1828_v7 }
0x1439   :  { %v1833_v63 = vmul.f32 %v1831_v8, %v1829_v3 }
0x143b   :  { %v1825_v9 = vpop.f32.mrf.mxu1  ;;  %v1834_v6 = vsel %vm1003_vm0, %v1833_v63, 0.0 }
0x143c   :  { %1835 = vadd.xlane.f32.xlu2 %v1834_v6 }
0x14af   :  { %v1836_v11 = vpop.xlane.xlu2 %1835 }
0x14b0   :  { %v1837_v12 = vadd.f32 %v1836_v11, %v2887_v43 }
0x14b2   :  { %1840 = vperm.xlu0 %2435, %v1837_v12  }
0x1524   :  { %v1841_v0 = vpop.permute.xlu0 %1840 }
0x1525   :  { %1843 = vst [vmem:[#allocation2] sm:$0xff] %v1841_v0 }
0x1526   :  { %1854 = dma.vmem_to_hbm [thread:$0]  %s1850_s16, 128, %s1852_s30, [#allocation3]  }
0x1527   :  { %2512 = dma.done.wait [#allocation3], 128  }
0x1528   :  { %2513 = vsyncadd [#allocation3], 4294967168 }
0x1529   :  { %1859 = vsyncpa [#allocation3], 1 }

</bundles_post_ra>
